<compile_context>
chip_gen: v7x
topology: tpu7x:2x2x1
jax: 0.10.0
libtpu: 0.0.40
codegen_flags: <defaults>
</compile_context>

<pallas_src>
import math

import jax
import jax.numpy as jnp
from jax import lax
from jax.experimental import pallas as pl
from jax.experimental.pallas import tpu as pltpu


def _round_up(x, m):
    return ((x + m - 1) // m) * m


def _make_kernel(*, n_valid, n_pad, tq, tk, ckp, cp):
    """Flash-style attention kernel with static tiling constants closed over."""

    def kernel(gamma_ref,                 # SMEM (1,)  scalar prefetch
               xq_ref,                    # (1, tq, cp) f32   query-side x tile
               xkv_ref,                   # (1, tk, cp) f32   key/value-side x tile
               wq_ref, bq_ref,            # (cp, ckp) bf16, (1, ckp) f32
               wkv_ref, bkv_ref,          # (cp, ckp+cp) bf16, (1, ckp+cp) f32
               o_ref,                     # (1, tq, cp)
               q_scr,                     # (tq, ckp) bf16
               m_scr, l_scr,              # (tq, 1) f32
               acc_scr):                  # (tq, cp) f32
        ki = pl.program_id(2)
        nk = pl.num_programs(2)

        # --- init: project q for this query tile, reset online-softmax state.
        @pl.when(ki == 0)
        def _():
            xq = xq_ref[0].astype(jnp.bfloat16)
            q = jnp.dot(xq, wq_ref[...], preferred_element_type=jnp.float32)
            q = q + bq_ref[...]
            q_scr[...] = q.astype(jnp.bfloat16)
            m_scr[...] = jnp.full_like(m_scr, -jnp.inf)
            l_scr[...] = jnp.zeros_like(l_scr)
            acc_scr[...] = jnp.zeros_like(acc_scr)

        # --- fused k|v projection for this kv tile (one lane-dense matmul).
        xkv = xkv_ref[0].astype(jnp.bfloat16)
        kv = jnp.dot(xkv, wkv_ref[...], preferred_element_type=jnp.float32)
        kv = kv + bkv_ref[...]
        k = kv[:, :ckp].astype(jnp.bfloat16)            # (tk, ckp) 128-aligned slice
        v = kv[:, ckp:].astype(jnp.bfloat16)            # (tk, cp)

        # --- scores: contract the last dims directly (no explicit transpose).
        s = lax.dot_general(q_scr[...], k,
                            dimension_numbers=(((1,), (1,)), ((), ())),
                            preferred_element_type=jnp.float32)   # (tq, tk)

        if n_pad != n_valid:
            # Mask key positions that are zero-padding past the real N.
            col = ki * tk + lax.broadcasted_iota(jnp.int32, (tq, tk), 1)
            s = jnp.where(col < n_valid, s, jnp.float32(-1e30))

        # --- online softmax update (f32 math, f32 accumulation).
        m_prev = m_scr[...]
        m_new = jnp.maximum(m_prev, jnp.max(s, axis=-1, keepdims=True))
        alpha = jnp.exp(m_prev - m_new)
        p = jnp.exp(s - m_new)
        l_scr[...] = alpha * l_scr[...] + jnp.sum(p, axis=-1, keepdims=True)
        pv = jnp.dot(p.astype(jnp.bfloat16), v,
                     preferred_element_type=jnp.float32)
        acc_scr[...] = alpha * acc_scr[...] + pv
        m_scr[...] = m_new

        # --- finalize: normalize (EUP approx recip), residual in f32, store.
        @pl.when(ki == nk - 1)
        def _():
            inv_l = pl.reciprocal(l_scr[...], approx=True)
            out = acc_scr[...] * inv_l
            y = gamma_ref[0] * out + xq_ref[0]
            o_ref[0] = y.astype(o_ref.dtype)

    return kernel


def attention_global_unit(x_nchw, params, *, tq=128, tk=128):
    """x_nchw: (B, C, H, W) float32.  Returns (B, C, H, W)."""
    B, C, H, W = x_nchw.shape
    N = H * W
    Ck = params["wq"].shape[1]

    cp = _round_up(C, 128)                     # lane-dense channel width
    ckp = _round_up(Ck, 128)                   # lane-dense projection width
    n_pad = _round_up(N, math.lcm(tq, tk))     # tile-divisible spatial length

    # NCHW -> (B, N, C) channels-last, zero-padded (glue; compute is in-kernel).
    x = jnp.transpose(x_nchw, (0, 2, 3, 1)).reshape(B, N, C)
    x = jnp.pad(x, ((0, 0), (0, n_pad - N), (0, cp - C)))

    f32 = jnp.float32
    wq = jnp.zeros((cp, ckp), f32).at[:C, :Ck].set(params["wq"])
    bq = jnp.zeros((1, ckp), f32).at[:, :Ck].set(params["bq"])
    wk = jnp.zeros((cp, ckp), f32).at[:C, :Ck].set(params["wk"])
    bk = jnp.zeros((1, ckp), f32).at[:, :Ck].set(params["bk"])
    wv = jnp.zeros((cp, cp), f32).at[:C, :C].set(params["wv"])
    bv = jnp.zeros((1, cp), f32).at[:, :C].set(params["bv"])
    # Fuse k|v projections; weights are bf16 MXU operands, biases stay f32.
    wq_b = wq.astype(jnp.bfloat16)
    wkv_b = jnp.concatenate([wk, wv], axis=1).astype(jnp.bfloat16)
    bkv = jnp.concatenate([bk, bv], axis=1)

    grid = (B, n_pad // tq, n_pad // tk)
    kernel = _make_kernel(n_valid=N, n_pad=n_pad, tq=tq, tk=tk, ckp=ckp, cp=cp)

    grid_spec = pltpu.PrefetchScalarGridSpec(
        num_scalar_prefetch=1,                # gamma -> SMEM
        grid=grid,
        in_specs=[
            pl.BlockSpec((1, tq, cp), lambda b, qi, ki, g: (b, qi, 0)),   # x (q tile)
            pl.BlockSpec((1, tk, cp), lambda b, qi, ki, g: (b, ki, 0)),   # x (kv tile)
            pl.BlockSpec((cp, ckp), lambda b, qi, ki, g: (0, 0)),         # wq
            pl.BlockSpec((1, ckp), lambda b, qi, ki, g: (0, 0)),          # bq
            pl.BlockSpec((cp, ckp + cp), lambda b, qi, ki, g: (0, 0)),    # w_k|v
            pl.BlockSpec((1, ckp + cp), lambda b, qi, ki, g: (0, 0)),     # b_k|v
        ],
        out_specs=pl.BlockSpec((1, tq, cp), lambda b, qi, ki, g: (b, qi, 0)),
        scratch_shapes=[
            pltpu.VMEM((tq, ckp), jnp.bfloat16),   # q tile (projected)
            pltpu.VMEM((tq, 1), jnp.float32),      # running max
            pltpu.VMEM((tq, 1), jnp.float32),      # running sum
            pltpu.VMEM((tq, cp), jnp.float32),     # output accumulator
        ],
    )

    y = pl.pallas_call(
        kernel,
        out_shape=jax.ShapeDtypeStruct((B, n_pad, cp), x_nchw.dtype),
        grid_spec=grid_spec,
        compiler_params=pltpu.CompilerParams(
            dimension_semantics=("parallel", "parallel", "arbitrary"),
            vmem_limit_bytes=32 * 1024 * 1024),
    )(params["gamma"], x, x, wq_b, bq, wkv_b, bkv)

    # Strip padding, (B, N, C) -> NCHW.
    y = y[:, :N, :C].reshape(B, H, W, C)
    return jnp.transpose(y, (0, 3, 1, 2))


def init_params(key, C):
    """Deterministic parameters matching AttentionLayer's shapes:
       query/key Conv2d(C, C//8, 1), value Conv2d(C, C, 1), scalar gamma."""
    Ck = max(C // 8, 1)
    k1, k2, k3, k4, k5, k6 = jax.random.split(key, 6)
    scale = 1.0 / jnp.sqrt(C)
    return {
        "wq": jax.random.normal(k1, (C, Ck), jnp.float32) * scale,
        "bq": jax.random.normal(k2, (1, Ck), jnp.float32) * 0.01,
        "wk": jax.random.normal(k3, (C, Ck), jnp.float32) * scale,
        "bk": jax.random.normal(k4, (1, Ck), jnp.float32) * 0.01,
        "wv": jax.random.normal(k5, (C, C), jnp.float32) * scale,
        "bv": jax.random.normal(k6, (1, C), jnp.float32) * 0.01,
        # SAGAN inits gamma to 0 (identity); use a nonzero deterministic value
        # here so the attention path is actually exercised.
        "gamma": jnp.array([0.5], dtype=jnp.float32),
    }


def _reference(x_nchw, params):
    """Pure-JAX f32 reference of the same forward."""
    B, C, H, W = x_nchw.shape
    N = H * W
    x = jnp.transpose(x_nchw, (0, 2, 3, 1)).reshape(B, N, C)
    q = x @ params["wq"] + params["bq"]
    k = x @ params["wk"] + params["bk"]
    v = x @ params["wv"] + params["bv"]
    s = jnp.einsum("bnc,bmc->bnm", q, k)
    p = jax.nn.softmax(s, axis=-1)
    out = jnp.einsum("bnm,bmc->bnc", p, v)
    y = params["gamma"][0] * out + x
    return jnp.transpose(y.reshape(B, H, W, C), (0, 3, 1, 2))


if __name__ == "__main__":
    key = jax.random.PRNGKey(0)
    kx1, kx2, kp1, kp2 = jax.random.split(key, 4)

    # Case 1: tile-divisible N (exercises multi-tile online softmax, B/q parallel).
    B, C, H, W = 2, 16, 16, 16
    x1 = jax.random.normal(kx1, (B, C, H, W), jnp.float32)
    p1 = init_params(kp1, C)
    y1 = jax.block_until_ready(attention_global_unit(x1, p1))
    r1 = _reference(x1, p1)
    assert y1.shape == (B, C, H, W)
    # bf16 MXU operands + approx reciprocal -> looser tolerance than pure f32.
    assert jnp.allclose(y1, r1, atol=5e-2, rtol=5e-2), "case 1 mismatch vs reference"

    # Case 2: ragged N and C (exercises spatial masking + channel padding).
    B2, C2, H2, W2 = 1, 20, 10, 9
    x2 = jax.random.normal(kx2, (B2, C2, H2, W2), jnp.float32)
    p2 = init_params(kp2, C2)
    y2 = jax.block_until_ready(attention_global_unit(x2, p2))
    r2 = _reference(x2, p2)
    assert y2.shape == (B2, C2, H2, W2)
    assert jnp.allclose(y2, r2, atol=5e-2, rtol=5e-2), "case 2 mismatch vs reference"

    print("KERNEL_OK")
</pallas_src>

<mosaic_0001>
module attributes {stable_mosaic.version = 11 : i64} {
  func.func @kernel(%arg0: i32, %arg1: i32, %arg2: i32, %arg3: memref<1xf32, #tpu.memory_space<smem>>, %arg4: memref<1x128x128xf32, #tpu.memory_space<vmem>>, %arg5: memref<1x128x128xf32, #tpu.memory_space<vmem>>, %arg6: memref<128x128xbf16, #tpu.memory_space<vmem>>, %arg7: memref<1x128xf32, #tpu.memory_space<vmem>>, %arg8: memref<128x256xbf16, #tpu.memory_space<vmem>>, %arg9: memref<1x256xf32, #tpu.memory_space<vmem>>, %arg10: memref<1x128x128xf32, #tpu.memory_space<vmem>>, %arg11: memref<128x128xbf16, #tpu.memory_space<vmem>>, %arg12: memref<128x1xf32, #tpu.memory_space<vmem>>, %arg13: memref<128x1xf32, #tpu.memory_space<vmem>>, %arg14: memref<128x128xf32, #tpu.memory_space<vmem>>) attributes {dimension_semantics = [#tpu.dimension_semantics<parallel>, #tpu.dimension_semantics<parallel>, #tpu.dimension_semantics<arbitrary>], iteration_bounds = array<i64: 2, 2, 2>, scalar_prefetch = 1 : i64, scratch_operands = 4 : i64, tpu.core_type = #tpu.core_type<tc>, window_params = [{transform_indices = @transform_0, window_bounds = array<i64: 1, 128, 128>}, {transform_indices = @transform_1, window_bounds = array<i64: 1, 128, 128>}, {pipeline_mode = #tpu.pipeline_mode<synchronous>, transform_indices = @transform_2, window_bounds = array<i64: 128, 128>}, {pipeline_mode = #tpu.pipeline_mode<synchronous>, transform_indices = @transform_3, window_bounds = array<i64: 1, 128>}, {pipeline_mode = #tpu.pipeline_mode<synchronous>, transform_indices = @transform_4, window_bounds = array<i64: 128, 256>}, {pipeline_mode = #tpu.pipeline_mode<synchronous>, transform_indices = @transform_5, window_bounds = array<i64: 1, 256>}, {transform_indices = @transform_6, window_bounds = array<i64: 1, 128, 128>}]} {
    %c0_i32 = arith.constant 0 : i32
    %0 = arith.cmpi eq, %arg2, %c0_i32 : i32
    %1 = arith.extui %0 : i1 to i32
    %c0_i32_0 = arith.constant 0 : i32
    %2 = arith.cmpi ne, %1, %c0_i32_0 : i32
    scf.if %2 {
      %c0_26 = arith.constant 0 : index
      %c0_27 = arith.constant 0 : index
      %c0_28 = arith.constant 0 : index
      %43 = vector.load %arg4[%c0_26, %c0_27, %c0_28] : memref<1x128x128xf32, #tpu.memory_space<vmem>>, vector<1x128x128xf32>
      %44 = vector.shape_cast %43 : vector<1x128x128xf32> to vector<128x128xf32>
      %45 = arith.truncf %44 : vector<128x128xf32> to vector<128x128xbf16>
      %c0_29 = arith.constant 0 : index
      %c0_30 = arith.constant 0 : index
      %46 = vector.load %arg6[%c0_29, %c0_30] : memref<128x128xbf16, #tpu.memory_space<vmem>>, vector<128x128xbf16>
      %cst_31 = arith.constant dense<0.000000e+00> : vector<128x128xf32>
      %47 = tpu.matmul %45, %46, %cst_31 {dimension_numbers = #tpu.dot_dimension_numbers<[1], [0], [0], [1], [0, 0, 1, 1], [], []>} : vector<128x128xbf16>, vector<128x128xbf16>, vector<128x128xf32> -> vector<128x128xf32>
      %c0_32 = arith.constant 0 : index
      %c0_33 = arith.constant 0 : index
      %48 = vector.load %arg7[%c0_32, %c0_33] : memref<1x128xf32, #tpu.memory_space<vmem>>, vector<1x128xf32>
      %49 = vector.broadcast %48 : vector<1x128xf32> to vector<128x128xf32>
      %50 = arith.addf %47, %49 : vector<128x128xf32>
      %51 = arith.truncf %50 : vector<128x128xf32> to vector<128x128xbf16>
      %c0_34 = arith.constant 0 : index
      %c0_35 = arith.constant 0 : index
      %52 = vector.load %arg11[%c0_34, %c0_35] : memref<128x128xbf16, #tpu.memory_space<vmem>>, vector<128x128xbf16>
      tpu.vector_store %arg11[%c0_34, %c0_35], %51 {strides = array<i32>} : memref<128x128xbf16, #tpu.memory_space<vmem>>, vector<128x128xbf16>,
      %cst_36 = arith.constant 0xFF800000 : f32
      %53 = vector.broadcast %cst_36 : f32 to vector<128x1xf32>
      %c0_37 = arith.constant 0 : index
      %c0_38 = arith.constant 0 : index
      %54 = vector.load %arg12[%c0_37, %c0_38] : memref<128x1xf32, #tpu.memory_space<vmem>>, vector<128x1xf32>
      tpu.vector_store %arg12[%c0_37, %c0_38], %53 {strides = array<i32>} : memref<128x1xf32, #tpu.memory_space<vmem>>, vector<128x1xf32>,
      %cst_39 = arith.constant 0.000000e+00 : f32
      %55 = vector.broadcast %cst_39 : f32 to vector<128x1xf32>
      %c0_40 = arith.constant 0 : index
      %c0_41 = arith.constant 0 : index
      %56 = vector.load %arg13[%c0_40, %c0_41] : memref<128x1xf32, #tpu.memory_space<vmem>>, vector<128x1xf32>
      tpu.vector_store %arg13[%c0_40, %c0_41], %55 {strides = array<i32>} : memref<128x1xf32, #tpu.memory_space<vmem>>, vector<128x1xf32>,
      %cst_42 = arith.constant 0.000000e+00 : f32
      %57 = vector.broadcast %cst_42 : f32 to vector<128x128xf32>
      %c0_43 = arith.constant 0 : index
      %c0_44 = arith.constant 0 : index
      %58 = vector.load %arg14[%c0_43, %c0_44] : memref<128x128xf32, #tpu.memory_space<vmem>>, vector<128x128xf32>
      tpu.vector_store %arg14[%c0_43, %c0_44], %57 {strides = array<i32>} : memref<128x128xf32, #tpu.memory_space<vmem>>, vector<128x128xf32>,
    } else {
    }
    %c0 = arith.constant 0 : index
    %c0_1 = arith.constant 0 : index
    %c0_2 = arith.constant 0 : index
    %3 = vector.load %arg5[%c0, %c0_1, %c0_2] : memref<1x128x128xf32, #tpu.memory_space<vmem>>, vector<1x128x128xf32>
    %4 = vector.shape_cast %3 : vector<1x128x128xf32> to vector<128x128xf32>
    %5 = arith.truncf %4 : vector<128x128xf32> to vector<128x128xbf16>
    %c0_3 = arith.constant 0 : index
    %c0_4 = arith.constant 0 : index
    %6 = vector.load %arg8[%c0_3, %c0_4] : memref<128x256xbf16, #tpu.memory_space<vmem>>, vector<128x256xbf16>
    %cst = arith.constant dense<0.000000e+00> : vector<128x256xf32>
    %7 = tpu.matmul %5, %6, %cst {dimension_numbers = #tpu.dot_dimension_numbers<[1], [0], [0], [1], [0, 0, 1, 1], [], []>} : vector<128x128xbf16>, vector<128x256xbf16>, vector<128x256xf32> -> vector<128x256xf32>
    %c0_5 = arith.constant 0 : index
    %c0_6 = arith.constant 0 : index
    %8 = vector.load %arg9[%c0_5, %c0_6] : memref<1x256xf32, #tpu.memory_space<vmem>>, vector<1x256xf32>
    %9 = vector.broadcast %8 : vector<1x256xf32> to vector<128x256xf32>
    %10 = arith.addf %7, %9 : vector<128x256xf32>
    %11 = vector.extract_strided_slice %10 {offsets = [0, 0], sizes = [128, 128], strides = [1, 1]} : vector<128x256xf32> to vector<128x128xf32>
    %12 = arith.truncf %11 : vector<128x128xf32> to vector<128x128xbf16>
    %13 = vector.extract_strided_slice %10 {offsets = [0, 128], sizes = [128, 128], strides = [1, 1]} : vector<128x256xf32> to vector<128x128xf32>
    %14 = arith.truncf %13 : vector<128x128xf32> to vector<128x128xbf16>
    %c0_7 = arith.constant 0 : index
    %c0_8 = arith.constant 0 : index
    %15 = vector.load %arg11[%c0_7, %c0_8] : memref<128x128xbf16, #tpu.memory_space<vmem>>, vector<128x128xbf16>
    %cst_9 = arith.constant dense<0.000000e+00> : vector<128x128xf32>
    %16 = tpu.matmul %15, %12, %cst_9 {dimension_numbers = #tpu.dot_dimension_numbers<[1], [1], [0], [0], [0, 0, 1, 0], [], []>} : vector<128x128xbf16>, vector<128x128xbf16>, vector<128x128xf32> -> vector<128x128xf32>
    %c0_10 = arith.constant 0 : index
    %c0_11 = arith.constant 0 : index
    %17 = vector.load %arg12[%c0_10, %c0_11] : memref<128x1xf32, #tpu.memory_space<vmem>>, vector<128x1xf32>
    %cst_12 = arith.constant dense<0xFF800000> : vector<128xf32>
    %18 = vector.multi_reduction <maximumf>, %16, %cst_12 [1] : vector<128x128xf32> to vector<128xf32>
    %19 = vector.shape_cast %18 : vector<128xf32> to vector<128x1xf32>
    %20 = arith.maximumf %17, %19 : vector<128x1xf32>
    %21 = arith.subf %17, %20 : vector<128x1xf32>
    %22 = math.exp %21 : vector<128x1xf32>
    %23 = vector.broadcast %20 : vector<128x1xf32> to vector<128x128xf32>
    %24 = arith.subf %16, %23 : vector<128x128xf32>
    %25 = math.exp %24 : vector<128x128xf32>
    %c0_13 = arith.constant 0 : index
    %c0_14 = arith.constant 0 : index
    %26 = vector.load %arg13[%c0_13, %c0_14] : memref<128x1xf32, #tpu.memory_space<vmem>>, vector<128x1xf32>
    %27 = arith.mulf %22, %26 : vector<128x1xf32>
    %cst_15 = arith.constant dense<0.000000e+00> : vector<128xf32>
    %28 = vector.multi_reduction <add>, %25, %cst_15 [1] : vector<128x128xf32> to vector<128xf32>
    %29 = vector.shape_cast %28 : vector<128xf32> to vector<128x1xf32>
    %30 = arith.addf %27, %29 : vector<128x1xf32>
    %c0_16 = arith.constant 0 : index
    %c0_17 = arith.constant 0 : index
    %31 = vector.load %arg13[%c0_16, %c0_17] : memref<128x1xf32, #tpu.memory_space<vmem>>, vector<128x1xf32>
    tpu.vector_store %arg13[%c0_16, %c0_17], %30 {strides = array<i32>} : memref<128x1xf32, #tpu.memory_space<vmem>>, vector<128x1xf32>,
    %32 = arith.truncf %25 : vector<128x128xf32> to vector<128x128xbf16>
    %cst_18 = arith.constant dense<0.000000e+00> : vector<128x128xf32>
    %33 = tpu.matmul %32, %14, %cst_18 {dimension_numbers = #tpu.dot_dimension_numbers<[1], [0], [0], [1], [0, 0, 1, 1], [], []>} : vector<128x128xbf16>, vector<128x128xbf16>, vector<128x128xf32> -> vector<128x128xf32>
    %c0_19 = arith.constant 0 : index
    %c0_20 = arith.constant 0 : index
    %34 = vector.load %arg14[%c0_19, %c0_20] : memref<128x128xf32, #tpu.memory_space<vmem>>, vector<128x128xf32>
    %35 = vector.broadcast %22 : vector<128x1xf32> to vector<128x128xf32>
    %36 = arith.mulf %35, %34 : vector<128x128xf32>
    %37 = arith.addf %36, %33 : vector<128x128xf32>
    %c0_21 = arith.constant 0 : index
    %c0_22 = arith.constant 0 : index
    %38 = vector.load %arg14[%c0_21, %c0_22] : memref<128x128xf32, #tpu.memory_space<vmem>>, vector<128x128xf32>
    tpu.vector_store %arg14[%c0_21, %c0_22], %37 {strides = array<i32>} : memref<128x128xf32, #tpu.memory_space<vmem>>, vector<128x128xf32>,
    %c0_23 = arith.constant 0 : index
    %c0_24 = arith.constant 0 : index
    %39 = vector.load %arg12[%c0_23, %c0_24] : memref<128x1xf32, #tpu.memory_space<vmem>>, vector<128x1xf32>
    tpu.vector_store %arg12[%c0_23, %c0_24], %20 {strides = array<i32>} : memref<128x1xf32, #tpu.memory_space<vmem>>, vector<128x1xf32>,
    %c1_i32 = arith.constant 1 : i32
    %40 = arith.cmpi eq, %arg2, %c1_i32 : i32
    %41 = arith.extui %40 : i1 to i32
    %c0_i32_25 = arith.constant 0 : i32
    %42 = arith.cmpi ne, %41, %c0_i32_25 : i32
    scf.if %42 {
      %c0_26 = arith.constant 0 : index
      %c0_27 = arith.constant 0 : index
      %43 = vector.load %arg13[%c0_26, %c0_27] : memref<128x1xf32, #tpu.memory_space<vmem>>, vector<128x1xf32>
      %44 = tpu.reciprocal %43 {approx = true} : vector<128x1xf32> -> vector<128x1xf32>
      %c0_28 = arith.constant 0 : index
      %c0_29 = arith.constant 0 : index
      %45 = vector.load %arg14[%c0_28, %c0_29] : memref<128x128xf32, #tpu.memory_space<vmem>>, vector<128x128xf32>
      %46 = vector.broadcast %44 : vector<128x1xf32> to vector<128x128xf32>
      %47 = arith.mulf %45, %46 : vector<128x128xf32>
      %c0_30 = arith.constant 0 : index
      %48 = memref.load %arg3[%c0_30] : memref<1xf32, #tpu.memory_space<smem>>
      %49 = vector.broadcast %48 : f32 to vector<128x128xf32>
      %50 = arith.mulf %49, %47 : vector<128x128xf32>
      %c0_31 = arith.constant 0 : index
      %c0_32 = arith.constant 0 : index
      %c0_33 = arith.constant 0 : index
      %51 = vector.load %arg4[%c0_31, %c0_32, %c0_33] : memref<1x128x128xf32, #tpu.memory_space<vmem>>, vector<1x128x128xf32>
      %52 = vector.shape_cast %51 : vector<1x128x128xf32> to vector<128x128xf32>
      %53 = arith.addf %50, %52 : vector<128x128xf32>
      %c0_34 = arith.constant 0 : index
      %c0_35 = arith.constant 0 : index
      %c0_36 = arith.constant 0 : index
      %54 = vector.load %arg10[%c0_34, %c0_35, %c0_36] : memref<1x128x128xf32, #tpu.memory_space<vmem>>, vector<1x128x128xf32>
      %55 = vector.shape_cast %54 : vector<1x128x128xf32> to vector<128x128xf32>
      %56 = vector.shape_cast %53 : vector<128x128xf32> to vector<1x128x128xf32>
      tpu.vector_store %arg10[%c0_34, %c0_35, %c0_36], %56 {strides = array<i32>} : memref<1x128x128xf32, #tpu.memory_space<vmem>>, vector<1x128x128xf32>,
    } else {
    }
    return
  }
  func.func @transform_0(%arg0: i32, %arg1: i32, %arg2: i32, %arg3: memref<1xf32, #tpu.memory_space<smem>>) -> (i32, i32, i32) {
    %c0_i32 = arith.constant 0 : i32
    %c0_i32_0 = arith.constant 0 : i32
    return %arg0, %arg1, %c0_i32 : i32, i32, i32
  }
  func.func @transform_1(%arg0: i32, %arg1: i32, %arg2: i32, %arg3: memref<1xf32, #tpu.memory_space<smem>>) -> (i32, i32, i32) {
    %c0_i32 = arith.constant 0 : i32
    %c0_i32_0 = arith.constant 0 : i32
    return %arg0, %arg2, %c0_i32 : i32, i32, i32
  }
  func.func @transform_2(%arg0: i32, %arg1: i32, %arg2: i32, %arg3: memref<1xf32, #tpu.memory_space<smem>>) -> (i32, i32) {
    %c0_i32 = arith.constant 0 : i32
    %c0_i32_0 = arith.constant 0 : i32
    %c0_i32_1 = arith.constant 0 : i32
    return %c0_i32, %c0_i32_0 : i32, i32
  }
  func.func @transform_3(%arg0: i32, %arg1: i32, %arg2: i32, %arg3: memref<1xf32, #tpu.memory_space<smem>>) -> (i32, i32) {
    %c0_i32 = arith.constant 0 : i32
    %c0_i32_0 = arith.constant 0 : i32
    %c0_i32_1 = arith.constant 0 : i32
    return %c0_i32, %c0_i32_0 : i32, i32
  }
  func.func @transform_4(%arg0: i32, %arg1: i32, %arg2: i32, %arg3: memref<1xf32, #tpu.memory_space<smem>>) -> (i32, i32) {
    %c0_i32 = arith.constant 0 : i32
    %c0_i32_0 = arith.constant 0 : i32
    %c0_i32_1 = arith.constant 0 : i32
    return %c0_i32, %c0_i32_0 : i32, i32
  }
  func.func @transform_5(%arg0: i32, %arg1: i32, %arg2: i32, %arg3: memref<1xf32, #tpu.memory_space<smem>>) -> (i32, i32) {
    %c0_i32 = arith.constant 0 : i32
    %c0_i32_0 = arith.constant 0 : i32
    %c0_i32_1 = arith.constant 0 : i32
    return %c0_i32, %c0_i32_0 : i32, i32
  }
  func.func @transform_6(%arg0: i32, %arg1: i32, %arg2: i32, %arg3: memref<1xf32, #tpu.memory_space<smem>>) -> (i32, i32, i32) {
    %c0_i32 = arith.constant 0 : i32
    %c0_i32_0 = arith.constant 0 : i32
    return %arg0, %arg1, %c0_i32 : i32, i32, i32
  }
}

</mosaic_0001>

<bundles_post_ra>
// kernel: tpu_custom_call.1
= control target key start
LH: loop header
LB: loop body
LE: loop exit
PB: predicated region body
PF: predicated region fallthrough
CT: control target
= control target key end

     0   :  { %s3739_s0 = inlined_call_operand.<no memory space> [shape: f32[1], index: 0, kind: input, shape index: {}]   ;;  %s3740_s1 = inlined_call_operand.hbm [shape: f32[2,256,128], index: 1, kind: input, shape index: {}]   ;;  %s3741_s2 = inlined_call_operand.hbm [shape: f32[2,256,128], index: 2, kind: input, shape index: {}]   ;;  %s3742_s3 = inlined_call_operand.hbm [shape: bf16[128,128], index: 3, kind: input, shape index: {}]   ;;  %s3743_s4 = inlined_call_operand.vmem [shape: f32[1,128], index: 4, kind: input, shape index: {}]   ;;  %s3744_s5 = inlined_call_operand.hbm [shape: bf16[128,256], index: 5, kind: input, shape index: {}]   ;;  %s3745_s6 = inlined_call_operand.vmem [shape: f32[1,256], index: 6, kind: input, shape index: {}]   ;;  %s3746_s7 = inlined_call_operand.hbm [shape: f32[2,256,128], index: 7, kind: output, shape index: {}]  }
   0x1   :  { %3769 = sst [smem:[#allocation33_spill]] %s3742_s3 }
   0x2   :  { %3770 = sst [smem:[#allocation34_spill]] %s3743_s4 }
   0x3   :  { %3771 = sst [smem:[#allocation35_spill]] %s3744_s5 }
   0x4   :  { %3772 = sst [smem:[#allocation36_spill]] %s3745_s6 }
   0x5   :  { %3773 = sst [smem:[#allocation37_spill]] %s3746_s7 }
   0x6   :  { %12 = sst [smem:[#allocation7]] %s3739_s0 }
   0x7   :  { %13 = vsyncpa [#allocation9], 0 }
   0x8   :  { %15 = vsyncpa [#allocation9 + $0x1], 0 }
   0x9   :  { %16 = vsyncpa [#allocation12], 0 }
   0xa   :  { %18 = vsyncpa [#allocation12 + $0x1], 0 }
   0xb   :  { %19 = vsyncpa [#allocation15], 0 }
   0xc   :  { %20 = vsyncpa [#allocation10], 0 }
   0xd   :  { %22 = vsyncpa [#allocation10 + $0x1], 0  ;;  %s2815_s26 = smov 0   ;;  %s2817_s27 = smov 0  }
   0xe   :  { %s2819_s28 = smov 0   ;;  %s2821_s29 = smov 0  }
   0xf   :  { %s2823_s30 = smov 0   ;;  %s2825_s8 = smov 0  }
  0x10   :  { %s2827_s0 = smov 0   ;;  %s2829_s9 = smov 0  }
  0x11   :  { %s2831_s10 = smov 0   ;;  %s2833_s11 = smov 0  }
  0x12   :  { %s2835_s12 = smov 0   ;;  %s2837_s13 = smov 0  }
  0x13   :  { %s2839_s14 = smov 0  }
  0x14 LB: > { %3774 = sst [smem:[#allocation22_spill]] %s2719_s29  ;;  %s2879_s15 = sadd.s32 4294967295, %s2755_s14   ;;  %s2755_s14 = sphi %s2839_s14, %s28_s14   ;;  %s2751_s13 = sphi %s2837_s13, %s3835_s13   ;;  %s2747_s12 = sphi %s2835_s12, %s3824_s12   ;;  %s2743_s11 = sphi %s2833_s11, %s3834_s11   ;;  %s2739_s10 = sphi %s2831_s10, %s3833_s10   ;;  %s2735_s9 = sphi %s2829_s9, %s3822_s9   ;;  %s2731_s0 = sphi %s2827_s0, %s3832_s0   ;;  %s2727_s8 = sphi %s2825_s8, %s3831_s8   ;;  %s2723_s30 = sphi %s2823_s30, %s3830_s30   ;;  %s2719_s29 = sphi %s2821_s29, %s3829_s29   ;;  %s2715_s28 = sphi %s2819_s28, %s3828_s28   ;;  %s2711_s27 = sphi %s2817_s27, %s3827_s27   ;;  %s2707_s26 = sphi %s2815_s26, %s3826_s26  }
  0x15   : > { %3775 = sst [smem:[#allocation23_spill]] %s2731_s0  ;;  %s1975_s16 = sadd.s32 4294967294, %s2755_s14  }
  0x16   : > { %3776 = sst [smem:[#allocation24_spill]] %s2735_s9  ;;  %p69_p0 = scmp.ne.s32.totalorder %s2723_s30, %s2719_s29 }
  0x17   : > { %3777 = sst [smem:[#allocation25_spill]] %s2739_s10  ;;  %p3750_p1 = scmp.eq.s32.totalorder %s2879_s15, 0 }
  0x18   : > { %3778 = sst [smem:[#allocation26_spill]] %s2747_s12  ;;  %p97_p2 = scmp.ne.s32.totalorder %s2711_s27, %s2707_s26 }
  0x19   : > { %3779 = sst [smem:[#allocation27_spill]] %s2879_s15  ;;  %p2888_p3 = por %p3750_p1, %p69_p0 }
  0x1a   : > { %p213_p4 = scmp.eq.s32.totalorder %s1975_s16, 7  ;;  %p2894_p5 = por %p97_p2, %p3750_p1 }
  0x1b   : > { %s3780_s17 = scalar_select %p2888_p3, 1, 0 }
  0x1c   : > { %s3781_s18 = scalar_select %p2894_p5, 1, 0 }
  0x1d   : > { %p1976_p6 = scmp.ge.s32.totalorder %s2755_s14, 1  ;;  %p2899_p7 = por %p213_p4, %p69_p0 }
  0x1e   : > { %3782 = sst [smem:[#allocation28_spill]] %s3781_s18  ;;  %p220_p8 = scmp.lt.s32.totalorder %s2755_s14, 9 }
  0x1f   : > { %s3783_s19 = scalar_select %p2899_p7, 1, 0 }
  0x20   : > { %p2904_p9 = pnand %p1976_p6, %p220_p8  ;;  %s2757_s21 = smov [#allocation13]  }
  0x21   : > { %3784 = sst [smem:[#allocation29_spill]] %s3783_s19  ;;  %s232_s22 = sshll.u32 %s2757_s21, 4  ;;  %s233_s22 = int_to_ptr.vmem [resolvable:$true] %s232_s22 }
  0x22   : > { %s3785_s20 = scalar_select %p2904_p9, 1, 0 }
  0x23   : > { %p2217_p10 = pneg %p2904_p9  ;;  %s2758_s24 = smov [#allocation14]  }
  0x24   : > { %s248_s25 = sshll.u32 %s2758_s24, 4  ;;  %s3787_s3 = sld [smem:[#allocation33_spill]]  ;;  %s2916_s25 = int_to_ptr.vmem [resolvable:$true] %s248_s25 }
  0x25   : > { %p2912_p11 = pnand %p2217_p10, %p3750_p1 }
  0x27   : > { %p2491_p13 = pneg %p2912_p11 }
  0x2a   : > { %s2489_s19 = scalar_lea.hbm %s3787_s3, 1024 }
  0x2b   : > { %p2490_p12 = scmp.ne.s32.totalorder %s3787_s3, %s2489_s19  ;;  %p2496_p4 = scmp.lt.u32.totalorder %s2489_s19, %s3787_s3 }
  0x2d   : > { %p2492_p0 = pnand %p2491_p13, %p2490_p12 }
  0x2f   : > { %p2493_p2 = pneg %p2492_p0 }
  0x31   : > { %p2498_p6 = pnand %p2496_p4, %p2493_p2 }
  0x33   : > { %2501 = shalt.err (!%p2498_p6)
}
  0x34   : > { %s2502_s24 = scalar_lea.vmem %s233_s22, 1024  ;;  %p2510_p7 = scmp.lt.s32.totalorder %s233_s22, %s233_s22 }
  0x35   : > { %p2503_p8 = scmp.ne.s32.totalorder %s233_s22, %s2502_s24  ;;  %p2511_p5 = scmp.lt.s32.totalorder %s2502_s24, %s2502_s24 }
  0x37   : > { %p2505_p10 = pnand %p2503_p8, %p2491_p13  ;;  %p2512_p3 = por %p2511_p5, %p2510_p7 }
  0x39   : > { %p2506_p1 = pneg %p2505_p10 }
  0x3b   : > { %p2513_p9 = pnand %p2512_p3, %p2506_p1 }
  0x3d   : > { %2516 = shalt.err (!%p2513_p9)
}
  0x3e   : > { %s2759_s29 = smov 64   ;;  %s2760_s26 = smov 4  }
  0x3f   : > { %2220 = dma.hbm_to_vmem [thread:$0]  (!%p2912_p11), %s3787_s3, 1024, %s233_s22, [#allocation12], %s2759_s29, %s2759_s29, %s2760_s26  }
  0x40   : > { %s3788_s5 = sld [smem:[#allocation35_spill]] }
  0x46   : > { %s2517_s21 = scalar_lea.hbm %s3788_s5, 2048 }
  0x47   : > { %p2518_p12 = scmp.ne.s32.totalorder %s3788_s5, %s2517_s21  ;;  %p2524_p5 = scmp.lt.u32.totalorder %s2517_s21, %s3788_s5 }
  0x49   : > { %p2520_p1 = pnand %p2518_p12, %p2491_p13 }
  0x4b   : > { %p2521_p3 = pneg %p2520_p1 }
  0x4d   : > { %p2526_p7 = pnand %p2524_p5, %p2521_p3 }
  0x4f   : > { %2529 = shalt.err (!%p2526_p7)
}
  0x50   : > { %s2530_s22 = scalar_lea.vmem %s2916_s25, 2048  ;;  %p2538_p4 = scmp.lt.s32.totalorder %s2916_s25, %s2916_s25 }
  0x51   : > { %p2531_p9 = scmp.ne.s32.totalorder %s2916_s25, %s2530_s22  ;;  %p2539_p6 = scmp.lt.s32.totalorder %s2530_s22, %s2530_s22 }
  0x53   : > { %p2533_p0 = pnand %p2531_p9, %p2491_p13  ;;  %p2540_p8 = por %p2539_p6, %p2538_p4 }
  0x55   : > { %p2534_p2 = pneg %p2533_p0 }
  0x57   : > { %p2541_p10 = pnand %p2540_p8, %p2534_p2 }
  0x59   : > { %2544 = shalt.err (!%p2541_p10)
}
  0x5a   : > { %s3754_s4 = smov 128   ;;  %s3756_s6 = smov 8  }
  0x5b   : > { %2223 = dma.hbm_to_vmem [thread:$0]  (!%p2912_p11), %s3788_s5, 2048, %s2916_s25, [#allocation15], %s3754_s4, %s3754_s4, %s3756_s6  }
  0x5c   : > { %p207_p13 = scmp.eq.s32.totalorder %s2879_s15, 7  ;;  %s40_s26 = sadd.s32 1, %s2743_s11 }
  0x5d   : > { %p41_p12 = scmp.ge.s32.totalorder %s40_s26, 2  ;;  %s43_s7 = sadd.s32 1, %s2747_s12 }
  0x5e   : > { %s47_s10 = sadd.s32 1, %s2751_s13  ;;  %p63_p1 = scmp.ne.s32.totalorder %s2727_s8, %s2723_s30 }
  0x5f   : > { %s3837_s26 = smov (%p41_p12, %s40_s26), 0  ;;  %s3839_s7 = smov (!%p41_p12, %s43_s7), %s2747_s12 }
  0x60   : > { %3789 = sst [smem:[#allocation30_spill]] %s3837_s26  ;;  %s56_s23 = sadd.s32 1, %s2727_s8 }
  0x61   : > { %p3768_p3 = scmp.eq.s32.totalorder %s2755_s14, 0  ;;  %p45_p11 = scmp.ge.s32.totalorder %s3839_s7, 2 }
  0x62   : > { %p2979_p5 = por %p207_p13, %p63_p1  ;;  %s80_s16 = ssub.s32 %s2743_s11, %s3837_s26 }
  0x63   : > { %p2985_p7 = por %p3768_p3, %p63_p1  ;;  %s3841_s7 = smov (%p45_p11, %s3839_s7), 0 }
  0x64   : > { %s3790_s25 = scalar_select %p2979_p5, 1, 0 }
  0x65   : > { %3793 = sst [smem:[#allocation32_spill]] %s3841_s7  ;;  %s3843_s10 = smov (!%p45_p11, %s47_s10), %s2751_s13 }
  0x66   : > { %3791 = sst [smem:[#allocation31_spill]] %s3790_s25  ;;  %p3767_p9 = scmp.lt.s32.totalorder %s2755_s14, 8 }
  0x67   : > { %s265_s21 = sand.u32 1, %s2727_s8   ;;  %p49_p0 = scmp.ge.s32.totalorder %s3843_s10, 2 }
  0x68   : > { %s52_s24 = ssub.s32 %s2747_s12, %s3841_s7  ;;  %s1980_s22 = sshll.u32 %s265_s21, 7 }
  0x69   : > { %s1981_s9 = sshll.u32 %s2747_s12, 4  ;;  %s3845_s10 = smov (%p49_p0, %s3843_s10), 0 }
  0x6a   : > { %s1982_s29 = sshll.u32 %s2751_s13, 5  ;;  %s51_s4 = ssub.s32 %s2751_s13, %s3845_s10 }
  0x6b   : > { %s275_s6 = sadd.s32 %s1982_s29, %s1981_s9  ;;  %s53_s3 = sor.u32 %s52_s24, %s51_s4 }
  0x6c   : > { %p54_p2 = scmp.eq.s32.totalorder %s53_s3, 0  ;;  %s3004_s5 = sor.u32 %s80_s16, %s51_s4 }
  0x6d   : > { %s1983_s26 = sshll.u32 %s275_s6, 7  ;;  %s269_s25 = scalar_lea.vmem [#allocation8], %s1980_s22 }
  0x6e   : > { %s278_s0 = sshll.u32 %s269_s25, 4  ;;  %s3012_s12 = scalar_lea.hbm %s3740_s1, %s1983_s26  ;;  %s3014_s0 = int_to_ptr.vmem [resolvable:$true] %s278_s0 }
  0x6f   : > { %s3007_s7 = scalar_select %p54_p2, %s2727_s8, %s56_s23  }
  0x70   : > { %p3020_p4 = pnand %p3767_p9, %p2985_p7  ;;  %s1985_s4 = sshll.u32 %s2743_s11, 4 }
  0x71   : > { %s3025_s6 = sadd.s32 %s1985_s4, %s1982_s29  ;;  %s3028_s15 = scalar_lea.sflag [#allocation9], %s265_s21 }
  0x72   : > { %s2545_s18 = scalar_lea.hbm %s3012_s12, 2048  ;;  %p2547_p10 = pneg %p3020_p4 }
  0x73   : > { %p2546_p8 = scmp.ne.s32.totalorder %s3012_s12, %s2545_s18  ;;  %s2550_s25 = scalar_lea.hbm %s3740_s1, 8192 }
  0x74   : > { %p2551_p1 = scmp.lt.u32.totalorder %s3012_s12, %s3740_s1  ;;  %p2552_p11 = scmp.lt.u32.totalorder %s2550_s25, %s2545_s18 }
  0x75   : > { %p2548_p13 = pnand %p2547_p10, %p2546_p8  ;;  %p2554_p0 = scmp.lt.u32.totalorder %s2545_s18, %s3012_s12 }
  0x76   : > { %p2553_p7 = por %p2552_p11, %p2551_p1 }
  0x77   : > { %p2549_p12 = pneg %p2548_p13 }
  0x78   : > { %p2555_p2 = por %p2554_p0, %p2553_p7 }
  0x7a   : > { %p2556_p9 = pnand %p2555_p2, %p2549_p12 }
  0x7c   : > { %2559 = shalt.err (!%p2556_p9)
}
  0x7d   : > { %s2560_s21 = scalar_lea.vmem %s3014_s0, 2048  ;;  %s2763_s24 = smov [#allocation8]  }
  0x7e   : > { %p2561_p8 = scmp.ne.s32.totalorder %s3014_s0, %s2560_s21  ;;  %s2565_s22 = sshll.u32 %s2763_s24, 4  ;;  %s2566_s22 = int_to_ptr.vmem [resolvable:$false] %s2565_s22 }
  0x7f   : > { %s2567_s9 = scalar_lea.vmem %s2566_s22, 4096  ;;  %p2568_p6 = scmp.lt.s32.totalorder %s3014_s0, %s2566_s22 }
  0x80   : > { %p2563_p13 = pnand %p2561_p8, %p2547_p10  ;;  %p2569_p1 = scmp.lt.s32.totalorder %s2567_s9, %s2560_s21 }
  0x82   : > { %p2564_p3 = pneg %p2563_p13  ;;  %p2570_p11 = por %p2569_p1, %p2568_p6 }
  0x84   : > { %p2571_p7 = pnand %p2570_p11, %p2564_p3 }
  0x86   : > { %2574 = shalt.err (!%p2571_p7)
}
  0x87   : > { %s3795_s29 = smov 8   ;;  %s3796_s4 = smov 128  }
  0x88   : > { %2227 = dma.hbm_to_vmem [thread:$0]  (!%p3020_p4), %s3012_s12, 2048, %s3014_s0, %s3028_s15, %s3796_s4, %s3796_s4, %s3795_s29  }
  0x89   : > { %s1987_s18 = sshll.u32 %s3025_s6, 7  ;;  %s84_s26 = sadd.s32 1, %s2715_s28 }
  0x8a   : > { %p91_p3 = scmp.ne.s32.totalorder %s2715_s28, %s2711_s27  ;;  %p3797_p9 = scmp.eq.s32.totalorder %s3004_s5, 0 }
  0x8b   : > { %p3798_p6 = scmp.eq.s32.totalorder %s2755_s14, 0  ;;  %s288_s23 = sand.u32 1, %s2755_s14  }
  0x8c   : > { %s3066_s3 = scalar_select %p3797_p9, %s2715_s28, %s84_s26  }
  0x8d   : > { %p93_p10 = por %p91_p3, %p3798_p6  ;;  %s3074_s16 = scalar_lea.hbm %s3741_s2, %s1987_s18 }
  0x8e   : > { %s290_s21 = sand.u32 1, %s2715_s28   ;;  %p3799_p4 = scmp.lt.s32.totalorder %s2755_s14, 8 }
  0x8f   : > { %s1984_s0 = sshll.u32 %s290_s21, 7  ;;  %s3085_s15 = scalar_lea.sflag [#allocation12], %s288_s23 }
  0x90   : > { %p3079_p12 = pnand %p3799_p4, %p93_p10  ;;  %s292_s5 = scalar_lea.vmem [#allocation11], %s1984_s0 }
  0x91   : > { %s301_s6 = sshll.u32 %s292_s5, 4  ;;  %s2575_s24 = scalar_lea.hbm %s3074_s16, 2048  ;;  %s3083_s6 = int_to_ptr.vmem [resolvable:$true] %s301_s6 }
  0x92   : > { %p2576_p0 = scmp.ne.s32.totalorder %s3074_s16, %s2575_s24  ;;  %p2577_p2 = pneg %p3079_p12 }
  0x93   : > { %s2580_s18 = scalar_lea.hbm %s3741_s2, 8192  ;;  %p2581_p1 = scmp.lt.u32.totalorder %s3074_s16, %s3741_s2 }
  0x94   : > { %p2578_p8 = pnand %p2577_p2, %p2576_p0  ;;  %p2582_p11 = scmp.lt.u32.totalorder %s2580_s18, %s2575_s24 }
  0x95   : > { %p2584_p3 = scmp.lt.u32.totalorder %s2575_s24, %s3074_s16 }
  0x96   : > { %p2579_p13 = pneg %p2578_p8  ;;  %p2583_p7 = por %p2582_p11, %p2581_p1 }
  0x98   : > { %p2585_p9 = por %p2584_p3, %p2583_p7 }
  0x9a   : > { %p2586_p6 = pnand %p2585_p9, %p2579_p13 }
  0x9c   : > { %2589 = shalt.err (!%p2586_p6)
}
  0x9d   : > { %s2590_s23 = scalar_lea.vmem %s3083_s6, 2048  ;;  %s2764_s19 = smov [#allocation11]  }
  0x9e   : > { %p2591_p10 = scmp.ne.s32.totalorder %s3083_s6, %s2590_s23  ;;  %s2595_s21 = sshll.u32 %s2764_s19, 4  ;;  %s2596_s21 = int_to_ptr.vmem [resolvable:$false] %s2595_s21 }
  0x9f   : > { %s2597_s0 = scalar_lea.vmem %s2596_s21, 4096  ;;  %p2598_p8 = scmp.lt.s32.totalorder %s3083_s6, %s2596_s21 }
  0xa0   : > { %p2593_p4 = pnand %p2591_p10, %p2577_p2  ;;  %p2599_p1 = scmp.lt.s32.totalorder %s2597_s0, %s2590_s23 }
  0xa2   : > { %p2594_p0 = pneg %p2593_p4  ;;  %p2600_p11 = por %p2599_p1, %p2598_p8 }
  0xa4   : > { %p2601_p7 = pnand %p2600_p11, %p2594_p0 }
  0xa6   : > { %2604 = shalt.err (!%p2601_p7)
}
  0xa7   : > { %2230 = dma.hbm_to_vmem [thread:$0]  (!%p3079_p12), %s3074_s16, 2048, %s3083_s6, %s3085_s15, %s3796_s4, %s3796_s4, %s3795_s29  }
  0xa8   : > { %p3801_p2 = scmp.ne.s32.totalorder %s3785_s20, 0 }
  0xa9   : > { %s3119_s5 = sand.u32 (!%p3801_p2), 1, %s2723_s30   ;;  %p3802_p13 = scmp.ne.s32.totalorder (!%p3801_p2), %s3780_s17, 0 }
  0xaa   : > { %313 = sbr.rel (%p3801_p2) target bundleno = 1704 (0x6a8), region = 44  ;;  %s1989_s24 = sshll.u32 (!%p3801_p2), %s3119_s5, 7 }
  0xab   : > { %s316_s22 = scalar_lea.sflag (!%p3801_p2), [#allocation9], %s3119_s5  ;;  %s3123_s9 = scalar_lea.vmem (!%p3801_p2), [#allocation8], %s1989_s24 }
  0xb1   : > { %2686 = dma.done.wait (%p3802_p13), %s316_s22, 2048  }
  0xb2   : > { %2688 = vsyncadd (%p3802_p13), %s316_s22, 4294965248  ;;  %s3803_s12 = sld [smem:[#allocation27_spill]]  ;;  %s3804_s29 = sld [smem:[#allocation28_spill]] }
  0xb3   : > { %s326_s4 = sand.u32 1, %s2711_s27  }
  0xb4   : > { %s1990_s16 = sshll.u32 %s326_s4, 7 }
  0xb5   : > { %s3131_s15 = scalar_lea.vmem [#allocation11], %s1990_s16 }
  0xb8   : > { %s324_s20 = sand.u32 1, %s3803_s12   ;;  %p3805_p12 = scmp.ne.s32.totalorder %s3804_s29, 0 }
  0xb9   : > { %s325_s6 = scalar_lea.sflag [#allocation12], %s324_s20 }
  0xba   : > { %2690 = dma.done.wait (%p3805_p12), %s325_s6, 2048  }
  0xbb   : > { %2692 = vsyncadd (%p3805_p12), %s325_s6, 4294965248  ;;  %p3806_p3 = scmp.eq.s32.totalorder %s3803_s12, 0 }
  0xbd   : > { %2694 = dma.done.wait (%p3806_p3), [#allocation12], 1024   ;;  %p3807_p9 = pmov %p3806_p3 }
  0xbe   : > { %p3808_p6 = pmov %p3806_p3 }
  0xbf   : > { %2696 = vsyncadd (%p3807_p9), [#allocation12], 4294966272 }
  0xc0   : > { %2698 = dma.done.wait (%p3808_p6), [#allocation15], 2048   ;;  %p3809_p10 = pmov %p3806_p3 }
  0xc1   : > { %s3145_s17 = scalar_lea.vmem [#allocation16], %s1989_s24  ;;  %s3810_s18 = sld [smem:[#allocation23_spill]] }
  0xc2   : > { %2700 = vsyncadd (%p3809_p10), [#allocation15], 4294965248 }
  0xc7   : > { %p1994_p4 = scmp.ne.s32.totalorder %s3810_s18, 0 }
  0xc8   : > { %v2357_v0 = vld [vmem:[#allocation13] sm:$0xff] (!%p1994_p4)   ;;  %v2358_v1 = vld [vmem:[#allocation13 + $0x8] sm:$0xff] (!%p1994_p4)   ;;  %v2359_v2 = vld [vmem:[#allocation13 + $0x10] sm:$0xff] (!%p1994_p4)   ;;  %vm586_vm0 = vcmask (!%p1994_p4), 7168   ;;  %v2765_v32 = vmov (!%p1994_p4), -inf   ;;  %v2766_v33 = vmov (!%p1994_p4), 0.0  }
  0xc9   : > { %377 = sbr.rel (%p1994_p4) target bundleno = 461 (0x1cd), region = 64  ;;  %2075 = vmatprep.subr.bf16.mxu0 (!%p1994_p4), %v2357_v0  ;;  %2171 = vmatprep.subr.bf16.mxu1 (!%p1994_p4), %v2357_v0  ;;  %v2360_v3 = vld [vmem:[#allocation13 + $0x18] sm:$0xff] (!%p1994_p4)   ;;  %v378_v4 = vld [vmem:[%s3123_s9] sm:$0xff] (!%p1994_p4)  ;;  %v379_v5 = vld [vmem:[%s3123_s9 + $0x8] sm:$0xff] (!%p1994_p4)  ;;  %587 = vst.msk [vmem:[#allocation3] sm:$0xff] (!%p1994_p4), %vm586_vm0, %v2765_v32  ;;  %s3811_s23 = sld [smem:[#allocation34_spill]] (!%p1994_p4) }
  0xca   : > { %2076 = vmatpush3.bf16.msra.mxu0 (!%p1994_p4), %v2357_v0  ;;  %2179 = vmatpush3.bf16.msra.mxu1 (!%p1994_p4), %v2357_v0  ;;  %v386_v6 = vld [vmem:[%s3123_s9 + $0x40] sm:$0xff] (!%p1994_p4)  ;;  %v394_v7 = vpack.c.bf16 (!%p1994_p4), %v379_v5, %v378_v4  ;;  %v387_v8 = vld [vmem:[%s3123_s9 + $0x48] sm:$0xff] (!%p1994_p4)  ;;  %v2363_v12 = vld [vmem:[#allocation13 + $0x30] sm:$0xff] (!%p1994_p4)   ;;  %588 = vst.msk [vmem:[#allocation3 + $0x8] sm:$0xff] (!%p1994_p4), %vm586_vm0, %v2765_v32 }
  0xcb   : > { %2077 = vmatprep.subr.bf16.mxu0 (!%p1994_p4), %v2358_v1  ;;  %2172 = vmatprep.subr.bf16.mxu1 (!%p1994_p4), %v2358_v1  ;;  %v398_v9 = vpack.c.bf16 (!%p1994_p4), %v387_v8, %v386_v6  ;;  %v2361_v10 = vld [vmem:[#allocation13 + $0x20] sm:$0xff] (!%p1994_p4)   ;;  %v2362_v11 = vld [vmem:[#allocation13 + $0x28] sm:$0xff] (!%p1994_p4)   ;;  %v2364_v13 = vld [vmem:[#allocation13 + $0x38] sm:$0xff] (!%p1994_p4)   ;;  %589 = vst.msk [vmem:[#allocation3 + $0x10] sm:$0xff] (!%p1994_p4), %vm586_vm0, %v2765_v32 }
  0xcc   : > { %2091 = vmatprep.mubr.bf16.mxu0 (!%p1994_p4), %v394_v7  ;;  %v380_v14 = vld [vmem:[%s3123_s9 + $0x10] sm:$0xff] (!%p1994_p4)  ;;  %v381_v15 = vld [vmem:[%s3123_s9 + $0x18] sm:$0xff] (!%p1994_p4)  ;;  %v382_v18 = vld [vmem:[%s3123_s9 + $0x20] sm:$0xff] (!%p1994_p4)  ;;  %590 = vst.msk [vmem:[#allocation3 + $0x18] sm:$0xff] (!%p1994_p4), %vm586_vm0, %v2765_v32 }
  0xcd   : > { %2099 = vmatprep.mubr.bf16.mxu1 (!%p1994_p4), %v398_v9  ;;  %v388_v16 = vld [vmem:[%s3123_s9 + $0x50] sm:$0xff] (!%p1994_p4)  ;;  %v389_v17 = vld [vmem:[%s3123_s9 + $0x58] sm:$0xff] (!%p1994_p4)  ;;  %v383_v19 = vld [vmem:[%s3123_s9 + $0x28] sm:$0xff] (!%p1994_p4)  ;;  %v395_v22 = vpack.c.bf16 (!%p1994_p4), %v381_v15, %v380_v14  ;;  %591 = vst.msk [vmem:[#allocation3 + $0x20] sm:$0xff] (!%p1994_p4), %vm586_vm0, %v2765_v32 }
  0xce   : > { %2078 = vmatpush3.bf16.msra.mxu0 (!%p1994_p4), %v2358_v1  ;;  %2180 = vmatpush3.bf16.msra.mxu1 (!%p1994_p4), %v2358_v1  ;;  %v390_v20 = vld [vmem:[%s3123_s9 + $0x60] sm:$0xff] (!%p1994_p4)  ;;  %v391_v21 = vld [vmem:[%s3123_s9 + $0x68] sm:$0xff] (!%p1994_p4)  ;;  %v399_v23 = vpack.c.bf16 (!%p1994_p4), %v389_v17, %v388_v16  ;;  %v396_v24 = vpack.c.bf16 (!%p1994_p4), %v383_v19, %v382_v18  ;;  %v384_v26 = vld [vmem:[%s3123_s9 + $0x30] sm:$0xff] (!%p1994_p4)  ;;  %592 = vst.msk [vmem:[#allocation3 + $0x28] sm:$0xff] (!%p1994_p4), %vm586_vm0, %v2765_v32 }
  0xcf   : > { %2079 = vmatprep.subr.bf16.mxu0 (!%p1994_p4), %v2359_v2  ;;  %2173 = vmatprep.subr.bf16.mxu1 (!%p1994_p4), %v2359_v2  ;;  %v400_v25 = vpack.c.bf16 (!%p1994_p4), %v391_v21, %v390_v20  ;;  %v385_v27 = vld [vmem:[%s3123_s9 + $0x38] sm:$0xff] (!%p1994_p4)  ;;  %v392_v28 = vld [vmem:[%s3123_s9 + $0x70] sm:$0xff] (!%p1994_p4)  ;;  %593 = vst.msk [vmem:[#allocation3 + $0x30] sm:$0xff] (!%p1994_p4), %vm586_vm0, %v2765_v32  ;;  %594 = vst.msk [vmem:[#allocation3 + $0x38] sm:$0xff] (!%p1994_p4), %vm586_vm0, %v2765_v32 }
  0xd0   : > { %v393_v29 = vld [vmem:[%s3123_s9 + $0x78] sm:$0xff]  ;;  %v397_v30 = vpack.c.bf16 %v385_v27, %v384_v26  ;;  %595 = vst.msk [vmem:[#allocation3 + $0x40] sm:$0xff] %vm586_vm0, %v2765_v32  ;;  %596 = vst.msk [vmem:[#allocation3 + $0x48] sm:$0xff] %vm586_vm0, %v2765_v32  ;;  %v1995_v35 = vld [vmem:[%s3811_s23] ss:$0 sm:$0xff] }
  0xd1   : > { %v401_v31 = vpack.c.bf16 %v393_v29, %v392_v28  ;;  %597 = vst.msk [vmem:[#allocation3 + $0x50] sm:$0xff] %vm586_vm0, %v2765_v32  ;;  %598 = vst.msk [vmem:[#allocation3 + $0x58] sm:$0xff] %vm586_vm0, %v2765_v32 }
  0xd2   : > { %2080 = vmatpush3.bf16.msra.mxu0 %v2359_v2  ;;  %2181 = vmatpush3.bf16.msra.mxu1 %v2359_v2  ;;  %599 = vst.msk [vmem:[#allocation3 + $0x60] sm:$0xff] %vm586_vm0, %v2765_v32  ;;  %600 = vst.msk [vmem:[#allocation3 + $0x68] sm:$0xff] %vm586_vm0, %v2765_v32 }
  0xd3   : > { %2081 = vmatprep.subr.bf16.mxu0 %v2360_v3  ;;  %2174 = vmatprep.subr.bf16.mxu1 %v2360_v3  ;;  %601 = vst.msk [vmem:[#allocation3 + $0x70] sm:$0xff] %vm586_vm0, %v2765_v32  ;;  %602 = vst.msk [vmem:[#allocation3 + $0x78] sm:$0xff] %vm586_vm0, %v2765_v32 }
  0xd4   : > { %603 = vst.msk [vmem:[#allocation4] sm:$0xff] %vm586_vm0, %v2766_v33  ;;  %604 = vst.msk [vmem:[#allocation4 + $0x8] sm:$0xff] %vm586_vm0, %v2766_v33 }
  0xd5   : > { %605 = vst.msk [vmem:[#allocation4 + $0x10] sm:$0xff] %vm586_vm0, %v2766_v33  ;;  %606 = vst.msk [vmem:[#allocation4 + $0x18] sm:$0xff] %vm586_vm0, %v2766_v33 }
  0xd6   : > { %2082 = vmatpush3.bf16.msra.mxu0 %v2360_v3  ;;  %2182 = vmatpush3.bf16.msra.mxu1 %v2360_v3  ;;  %607 = vst.msk [vmem:[#allocation4 + $0x20] sm:$0xff] %vm586_vm0, %v2766_v33  ;;  %608 = vst.msk [vmem:[#allocation4 + $0x28] sm:$0xff] %vm586_vm0, %v2766_v33 }
  0xd7   : > { %2083 = vmatprep.subr.bf16.mxu0 %v2361_v10  ;;  %2175 = vmatprep.subr.bf16.mxu1 %v2361_v10  ;;  %609 = vst.msk [vmem:[#allocation4 + $0x30] sm:$0xff] %vm586_vm0, %v2766_v33  ;;  %610 = vst.msk [vmem:[#allocation4 + $0x38] sm:$0xff] %vm586_vm0, %v2766_v33 }
  0xd8   : > { %611 = vst.msk [vmem:[#allocation4 + $0x40] sm:$0xff] %vm586_vm0, %v2766_v33  ;;  %612 = vst.msk [vmem:[#allocation4 + $0x48] sm:$0xff] %vm586_vm0, %v2766_v33 }
  0xd9   : > { %613 = vst.msk [vmem:[#allocation4 + $0x50] sm:$0xff] %vm586_vm0, %v2766_v33  ;;  %614 = vst.msk [vmem:[#allocation4 + $0x58] sm:$0xff] %vm586_vm0, %v2766_v33 }
  0xda   : > { %2084 = vmatpush3.bf16.msra.mxu0 %v2361_v10  ;;  %2183 = vmatpush3.bf16.msra.mxu1 %v2361_v10  ;;  %615 = vst.msk [vmem:[#allocation4 + $0x60] sm:$0xff] %vm586_vm0, %v2766_v33  ;;  %616 = vst.msk [vmem:[#allocation4 + $0x68] sm:$0xff] %vm586_vm0, %v2766_v33 }
  0xdb   : > { %2085 = vmatprep.subr.bf16.mxu0 %v2362_v11  ;;  %2176 = vmatprep.subr.bf16.mxu1 %v2362_v11  ;;  %617 = vst.msk [vmem:[#allocation4 + $0x70] sm:$0xff] %vm586_vm0, %v2766_v33  ;;  %618 = vst.msk [vmem:[#allocation4 + $0x78] sm:$0xff] %vm586_vm0, %v2766_v33 }
  0xdc   : > { %619 = vst [vmem:[#allocation5] sm:$0xff] %v2766_v33  ;;  %620 = vst [vmem:[#allocation5 + $0x8] sm:$0xff] %v2766_v33 }
  0xdd   : > { %621 = vst [vmem:[#allocation5 + $0x10] sm:$0xff] %v2766_v33  ;;  %622 = vst [vmem:[#allocation5 + $0x18] sm:$0xff] %v2766_v33 }
  0xde   : > { %2086 = vmatpush3.bf16.msra.mxu0 %v2362_v11  ;;  %2184 = vmatpush3.bf16.msra.mxu1 %v2362_v11  ;;  %623 = vst [vmem:[#allocation5 + $0x20] sm:$0xff] %v2766_v33  ;;  %624 = vst [vmem:[#allocation5 + $0x28] sm:$0xff] %v2766_v33 }
  0xdf   : > { %2087 = vmatprep.subr.bf16.mxu0 %v2363_v12  ;;  %2177 = vmatprep.subr.bf16.mxu1 %v2363_v12  ;;  %625 = vst [vmem:[#allocation5 + $0x30] sm:$0xff] %v2766_v33  ;;  %626 = vst [vmem:[#allocation5 + $0x38] sm:$0xff] %v2766_v33 }
  0xe0   : > { %627 = vst [vmem:[#allocation5 + $0x40] sm:$0xff] %v2766_v33  ;;  %628 = vst [vmem:[#allocation5 + $0x48] sm:$0xff] %v2766_v33 }
  0xe1   : > { %629 = vst [vmem:[#allocation5 + $0x50] sm:$0xff] %v2766_v33  ;;  %630 = vst [vmem:[#allocation5 + $0x58] sm:$0xff] %v2766_v33 }
  0xe2   : > { %2088 = vmatpush3.bf16.msra.mxu0 %v2363_v12  ;;  %2185 = vmatpush3.bf16.msra.mxu1 %v2363_v12  ;;  %631 = vst [vmem:[#allocation5 + $0x60] sm:$0xff] %v2766_v33  ;;  %632 = vst [vmem:[#allocation5 + $0x68] sm:$0xff] %v2766_v33 }
  0xe3   : > { %2089 = vmatprep.subr.bf16.mxu0 %v2364_v13  ;;  %2178 = vmatprep.subr.bf16.mxu1 %v2364_v13  ;;  %633 = vst [vmem:[#allocation5 + $0x70] sm:$0xff] %v2766_v33  ;;  %634 = vst [vmem:[#allocation5 + $0x78] sm:$0xff] %v2766_v33 }
  0xe6   : > { %2090 = vmatpush3.bf16.msra.mxu0 %v2364_v13  ;;  %2186 = vmatpush3.bf16.msra.mxu1 %v2364_v13 }
  0xe9   : > { %2092 = vmatmul.mubr.bf16.vlgmr.msra.gmra.mrb[0].mxu0 %v395_v22  ;;  %2100 = vmatmul.mubr.bf16.vlgmr.msra.gmra.mrb[0].mxu1 %v399_v23 }
  0xea   : > { %2095 = vmatprep.mubr.bf16.mxu0 %v396_v24  ;;  %2103 = vmatprep.mubr.bf16.mxu1 %v400_v25 }
  0xf1   : > { %2096 = vmatmul.mubr.bf16.gmra.mrb[4].mxu0 %v397_v30  ;;  %2104 = vmatmul.mubr.bf16.gmra.mrb[4].mxu1 %v401_v31 }
 0x1bc   : > { %v2093_v34 = vpop.f32.mrb[0].mxu0  ;;  %v2101_v36 = vpop.f32.mrb[0].mxu1 }
 0x1bd   : > { %v507_v37 = vpop.f32.mrb[1].mxu0  ;;  %v539_v38 = vpop.f32.mrb[1].mxu1  ;;  %v516_v41 = vadd.f32 %v2093_v34, %v1995_v35  ;;  %v548_v42 = vadd.f32 %v2101_v36, %v1995_v35 }
 0x1be   : > { %v2094_v39 = vpop.f32.mrb[2].mxu0  ;;  %v2102_v40 = vpop.f32.mrb[2].mxu1  ;;  %v508_v47 = vadd.f32 %v1995_v35, %v507_v37  ;;  %v540_v48 = vadd.f32 %v1995_v35, %v539_v38 }
 0x1bf   : > { %v519_v43 = vadd.f32 %v2094_v39, %v1995_v35  ;;  %v551_v44 = vadd.f32 %v2102_v40, %v1995_v35  ;;  %v510_v45 = vpop.f32.mrb[3].mxu0  ;;  %v542_v46 = vpop.f32.mrb[3].mxu1 }
 0x1c0   : > { %v511_v49 = vadd.f32 %v1995_v35, %v510_v45  ;;  %v543_v50 = vadd.f32 %v1995_v35, %v542_v46 }
 0x1c1   : > { %v571_v51 = vpack.c.bf16 %v519_v43, %v516_v41  ;;  %v575_v52 = vpack.c.bf16 %v551_v44, %v548_v42 }
 0x1c2   : > { %v570_v53 = vpack.c.bf16 %v511_v49, %v508_v47  ;;  %v574_v54 = vpack.c.bf16 %v543_v50, %v540_v48 }
 0x1c3   : > { %579 = vst [vmem:[#allocation2 + $0x8] sm:$0xff] %v571_v51  ;;  %583 = vst [vmem:[#allocation2 + $0x28] sm:$0xff] %v575_v52 }
 0x1c4   : > { %578 = vst [vmem:[#allocation2] sm:$0xff] %v570_v53  ;;  %582 = vst [vmem:[#allocation2 + $0x20] sm:$0xff] %v574_v54  ;;  %v2097_v55 = vpop.f32.mrb[4].mxu0  ;;  %v2105_v56 = vpop.f32.mrb[4].mxu1 }
 0x1c5   : > { %v523_v57 = vpop.f32.mrb[5].mxu0  ;;  %v555_v58 = vpop.f32.mrb[5].mxu1  ;;  %v532_v61 = vadd.f32 %v2097_v55, %v1995_v35  ;;  %v564_v62 = vadd.f32 %v2105_v56, %v1995_v35 }
 0x1c6   : > { %v2098_v59 = vpop.f32.mrb[6].mxu0  ;;  %v2106_v60 = vpop.f32.mrb[6].mxu1  ;;  %v524_v3 = vadd.f32 %v1995_v35, %v523_v57  ;;  %v556_v4 = vadd.f32 %v1995_v35, %v555_v58 }
 0x1c7   : > { %v535_v63 = vadd.f32 %v2098_v59, %v1995_v35  ;;  %v567_v0 = vadd.f32 %v2106_v60, %v1995_v35  ;;  %v526_v1 = vpop.f32.mrb[7].mxu0  ;;  %v558_v2 = vpop.f32.mrb[7].mxu1 }
 0x1c8   : > { %v527_v5 = vadd.f32 %v1995_v35, %v526_v1  ;;  %v559_v6 = vadd.f32 %v1995_v35, %v558_v2 }
 0x1c9   : > { %v573_v7 = vpack.c.bf16 %v535_v63, %v532_v61  ;;  %v577_v8 = vpack.c.bf16 %v567_v0, %v564_v62 }
 0x1ca   : > { %v572_v9 = vpack.c.bf16 %v527_v5, %v524_v3  ;;  %v576_v10 = vpack.c.bf16 %v559_v6, %v556_v4 }
 0x1cb   : > { %581 = vst [vmem:[#allocation2 + $0x18] sm:$0xff] %v573_v7  ;;  %585 = vst [vmem:[#allocation2 + $0x38] sm:$0xff] %v577_v8 }
 0x1cc   : > { %580 = vst [vmem:[#allocation2 + $0x10] sm:$0xff] %v572_v9  ;;  %584 = vst [vmem:[#allocation2 + $0x30] sm:$0xff] %v576_v10 }
 0x1cd PF: > { %v2367_v11 = vld [vmem:[#allocation14 + $0x4] ss:$8 sps:$4 sm:$0xff]   ;;  %v2369_v12 = vld [vmem:[#allocation14] ss:$8 sps:$4 sm:$0xff]   ;;  %v2767_v13 = vmov 0   ;;  %v637_v31 = vld [vmem:[%s3131_s15 + $0x10] sm:$0xff]  ;;  %v677_v53 = vlaneseq }
 0x1ce   : > { %799 = vmatprep.mubr.bf16.mxu0 %v2767_v13  ;;  %2365 = vset.pattern.permute.xlu1 %v2767_v13  ;;  %v2370_v14 = vld [vmem:[#allocation14 + $0x14] ss:$8 sps:$4 sm:$0xff]   ;;  %v2372_v15 = vld [vmem:[#allocation14 + $0x10] ss:$8 sps:$4 sm:$0xff]   ;;  %v2373_v16 = vld [vmem:[#allocation14 + $0x24] ss:$8 sps:$4 sm:$0xff]  }
 0x1cf   : > { %767 = vmatprep.subr.bf16.mxu0 %v2367_v11  ;;  %2366 = vset.pattern.permute.xlu0 %v2767_v13  ;;  %v2375_v17 = vld [vmem:[#allocation14 + $0x20] ss:$8 sps:$4 sm:$0xff]   ;;  %v2376_v18 = vld [vmem:[#allocation14 + $0x34] ss:$8 sps:$4 sm:$0xff]   ;;  %v2378_v19 = vld [vmem:[#allocation14 + $0x30] ss:$8 sps:$4 sm:$0xff]  }
 0x1d0   : > { %768 = vmatpush1.bf16.msra.mxu0 %v2369_v12  ;;  %v2379_v20 = vld [vmem:[#allocation14 + $0x44] ss:$8 sps:$4 sm:$0xff]   ;;  %v2381_v21 = vld [vmem:[#allocation14 + $0x40] ss:$8 sps:$4 sm:$0xff]   ;;  %v2382_v22 = vld [vmem:[#allocation14 + $0x54] ss:$8 sps:$4 sm:$0xff]  }
 0x1d1   : > { %769 = vmatprep.subr.bf16.mxu0 %v2370_v14  ;;  %v2384_v23 = vld [vmem:[#allocation14 + $0x50] ss:$8 sps:$4 sm:$0xff]   ;;  %v2385_v24 = vld [vmem:[#allocation14 + $0x64] ss:$8 sps:$4 sm:$0xff]   ;;  %v2387_v25 = vld [vmem:[#allocation14 + $0x60] ss:$8 sps:$4 sm:$0xff]  }
 0x1d2   : > { %v2388_v26 = vld [vmem:[#allocation14 + $0x74] ss:$8 sps:$4 sm:$0xff]   ;;  %v2390_v27 = vld [vmem:[#allocation14 + $0x70] ss:$8 sps:$4 sm:$0xff]   ;;  %v635_v28 = vld [vmem:[%s3131_s15] sm:$0xff]  ;;  %v678_v54 = vshrl.u32 %v677_v53, 7 }
 0x1d3   : > { %v636_v29 = vld [vmem:[%s3131_s15 + $0x8] sm:$0xff]  ;;  %v638_v32 = vld [vmem:[%s3131_s15 + $0x18] sm:$0xff]  ;;  %v639_v34 = vld [vmem:[%s3131_s15 + $0x20] sm:$0xff]  ;;  %s3812_s0 = sld [smem:[#allocation36_spill]]  ;;  %vm1321_vm1 = vcmask 7168   ;;  %s3813_s24 = sld [smem:[#allocation23_spill]] }
 0x1d4   : > { %770 = vmatpush1.bf16.msra.mxu0 %v2372_v15  ;;  %v651_v30 = vpack.c.bf16 %v636_v29, %v635_v28  ;;  %v652_v33 = vpack.c.bf16 %v638_v32, %v637_v31  ;;  %v640_v35 = vld [vmem:[%s3131_s15 + $0x28] sm:$0xff]  ;;  %v641_v37 = vld [vmem:[%s3131_s15 + $0x30] sm:$0xff]  ;;  %v642_v38 = vld [vmem:[%s3131_s15 + $0x38] sm:$0xff]  ;;  %v679_v55 = vsub.s32 0, %v678_v54  ;;  %v683_v57 = vsub.s32 1, %v678_v54 }
 0x1d5   : > { %771 = vmatprep.subr.bf16.mxu0 %v2373_v16  ;;  %v653_v36 = vpack.c.bf16 %v640_v35, %v639_v34  ;;  %v654_v39 = vpack.c.bf16 %v642_v38, %v641_v37  ;;  %v643_v40 = vld [vmem:[%s3131_s15 + $0x40] sm:$0xff]  ;;  %v644_v41 = vld [vmem:[%s3131_s15 + $0x48] sm:$0xff]  ;;  %v645_v43 = vld [vmem:[%s3131_s15 + $0x50] sm:$0xff] }
 0x1d6   : > { %v655_v42 = vpack.c.bf16 %v644_v41, %v643_v40  ;;  %v646_v44 = vld [vmem:[%s3131_s15 + $0x58] sm:$0xff]  ;;  %v647_v46 = vld [vmem:[%s3131_s15 + $0x60] sm:$0xff]  ;;  %v648_v47 = vld [vmem:[%s3131_s15 + $0x68] sm:$0xff] }
 0x1d7   : > { %v656_v45 = vpack.c.bf16 %v646_v44, %v645_v43  ;;  %v657_v48 = vpack.c.bf16 %v648_v47, %v647_v46  ;;  %v649_v49 = vld [vmem:[%s3131_s15 + $0x70] sm:$0xff]  ;;  %v650_v50 = vld [vmem:[%s3131_s15 + $0x78] sm:$0xff]  ;;  %v896_v52 = vld [vmem:[#allocation2] sm:$0xff] }
 0x1d8   : > { %772 = vmatpush1.bf16.msra.mxu0 %v2375_v17  ;;  %v658_v51 = vpack.c.bf16 %v650_v50, %v649_v49  ;;  %2123 = vmatprep.mubr.bf16.mxu1 %v896_v52 }
 0x1d9   : > { %773 = vmatprep.subr.bf16.mxu0 %v2376_v18  ;;  %v675_v56 = vld [vmem:[%s3812_s0] sm:$0x3]  ;;  %p2020_p0 = scmp.ne.s32.totalorder %s3813_s24, 1 }
 0x1da   : > { %v3228_v58 = vrot.slane %v675_v56, %v679_v55  ;;  %v3230_v60 = vrot.slane %v675_v56, %v683_v57  ;;  %s1751_s22 = sld [smem:[#allocation7]] (!%p2020_p0) }
 0x1dc   : > { %774 = vmatpush1.bf16.msra.mxu0 %v2378_v19 }
 0x1dd   : > { %775 = vmatprep.subr.bf16.mxu0 %v2379_v20 }
 0x1e0   : > { %776 = vmatpush1.bf16.msra.mxu0 %v2381_v21 }
 0x1e1   : > { %777 = vmatprep.subr.bf16.mxu0 %v2382_v22 }
 0x1e4   : > { %778 = vmatpush1.bf16.msra.mxu0 %v2384_v23 }
 0x1e5   : > { %779 = vmatprep.subr.bf16.mxu0 %v2385_v24 }
 0x1e8   : > { %780 = vmatpush1.bf16.msra.mxu0 %v2387_v25 }
 0x1e9   : > { %781 = vmatprep.subr.bf16.mxu0 %v2388_v26 }
 0x1ec   : > { %782 = vmatpush1.bf16.msra.mxu0 %v2390_v27 }
 0x1ef   : > { %800 = vmatmul.mubr.bf16.vlgmr.msra.gmra.mrb[0].mxu0 %v651_v30 }
 0x1f0   : > { %809 = vmatprep.mubr.bf16.mxu0 %v2767_v13 }
 0x1f7   : > { %810 = vmatmul.mubr.bf16.gmra.mrb[4].mxu0 %v652_v33 }
 0x1f8   : > { %819 = vmatprep.mubr.bf16.mxu0 %v2767_v13 }
 0x1ff   : > { %820 = vmatmul.mubr.bf16.gmra.mrb[8].mxu0 %v653_v36 }
 0x200   : > { %829 = vmatprep.mubr.bf16.mxu0 %v2767_v13 }
 0x207   : > { %830 = vmatmul.mubr.bf16.gmra.mrb[12].mxu0 %v654_v39 }
 0x208   : > { %839 = vmatprep.mubr.bf16.mxu0 %v2767_v13 }
 0x20f   : > { %840 = vmatmul.mubr.bf16.gmra.mrb[16].mxu0 %v655_v42 }
 0x210   : > { %849 = vmatprep.mubr.bf16.mxu0 %v2767_v13 }
 0x217   : > { %850 = vmatmul.mubr.bf16.gmra.mrb[20].mxu0 %v656_v45 }
 0x218   : > { %859 = vmatprep.mubr.bf16.mxu0 %v2767_v13 }
 0x21f   : > { %860 = vmatmul.mubr.bf16.gmra.mrb[24].mxu0 %v657_v48 }
 0x220   : > { %869 = vmatprep.mubr.bf16.mxu0 %v2767_v13 }
 0x227   : > { %870 = vmatmul.mubr.bf16.gmra.mrb[28].mxu0 %v658_v51 }
 0x2c2   : > { %v801_v59 = vpop.f32.mrb[0].mxu0 }
 0x2c3   : > { %v803_v61 = vpop.f32.mrb[1].mxu0  ;;  %v802_v63 = vadd.f32 %v801_v59, %v3228_v58 }
 0x2c4   : > { %v805_v62 = vpop.f32.mrb[2].mxu0  ;;  %v804_v2 = vadd.f32 %v803_v61, %v3230_v60 }
 0x2c5   : > { %v806_v0 = vadd.f32 %v805_v62, %v3228_v58  ;;  %v807_v1 = vpop.f32.mrb[3].mxu0 }
 0x2c6   : > { %v808_v3 = vadd.f32 %v807_v1, %v3230_v60 }
 0x2c7   : > { %v880_v4 = vpack.c.bf16 %v806_v0, %v802_v63 }
 0x2c8   : > { %v3236_v5 = vpack.c.bf16 %v808_v3, %v804_v2 }
 0x2c9   : > { %2107 = vmatprep.subr.bf16.mxu1 %v880_v4 }
 0x2ca   : > { %v811_v6 = vpop.f32.mrb[4].mxu0  ;;  %2108 = vmatpush3.bf16.xpose.msra.mxu1 %v880_v4  ;;  %2139 = vmatprep.subr.bf16.mxu0 %v3236_v5 }
 0x2cb   : > { %v813_v7 = vpop.f32.mrb[5].mxu0  ;;  %2140 = vmatpush3.bf16.msra.mxu0 %v3236_v5  ;;  %v812_v9 = vadd.f32 %v811_v6, %v3228_v58 }
 0x2cc   : > { %v815_v8 = vpop.f32.mrb[6].mxu0  ;;  %v814_v12 = vadd.f32 %v813_v7, %v3230_v60 }
 0x2cd   : > { %v816_v10 = vadd.f32 %v815_v8, %v3228_v58  ;;  %v817_v11 = vpop.f32.mrb[7].mxu0 }
 0x2ce   : > { %v818_v13 = vadd.f32 %v817_v11, %v3230_v60 }
 0x2cf   : > { %v881_v14 = vpack.c.bf16 %v816_v10, %v812_v9 }
 0x2d0   : > { %v3244_v15 = vpack.c.bf16 %v818_v13, %v814_v12 }
 0x2d1   : > { %2109 = vmatprep.subr.bf16.mxu1 %v881_v14 }
 0x2d2   : > { %v821_v16 = vpop.f32.mrb[8].mxu0  ;;  %2110 = vmatpush3.bf16.xpose.msra.mxu1 %v881_v14  ;;  %2141 = vmatprep.subr.bf16.mxu0 %v3244_v15 }
 0x2d3   : > { %v823_v17 = vpop.f32.mrb[9].mxu0  ;;  %2142 = vmatpush3.bf16.msra.mxu0 %v3244_v15  ;;  %v822_v19 = vadd.f32 %v821_v16, %v3228_v58  ;;  %v897_v16 = vld [vmem:[#allocation2 + $0x8] sm:$0xff] }
 0x2d4   : > { %v825_v18 = vpop.f32.mrb[10].mxu0  ;;  %v824_v22 = vadd.f32 %v823_v17, %v3230_v60  ;;  %v898_v17 = vld [vmem:[#allocation2 + $0x10] sm:$0xff] }
 0x2d5   : > { %v826_v20 = vadd.f32 %v825_v18, %v3228_v58  ;;  %v827_v21 = vpop.f32.mrb[11].mxu0  ;;  %v901_v18 = vld [vmem:[#allocation2 + $0x28] sm:$0xff] }
 0x2d6   : > { %v828_v23 = vadd.f32 %v827_v21, %v3230_v60 }
 0x2d7   : > { %v882_v24 = vpack.c.bf16 %v826_v20, %v822_v19 }
 0x2d8   : > { %v3252_v25 = vpack.c.bf16 %v828_v23, %v824_v22 }
 0x2d9   : > { %2111 = vmatprep.subr.bf16.mxu1 %v882_v24 }
 0x2da   : > { %v831_v26 = vpop.f32.mrb[12].mxu0  ;;  %2112 = vmatpush3.bf16.xpose.msra.mxu1 %v882_v24  ;;  %2143 = vmatprep.subr.bf16.mxu0 %v3252_v25 }
 0x2db   : > { %v833_v27 = vpop.f32.mrb[13].mxu0  ;;  %2144 = vmatpush3.bf16.msra.mxu0 %v3252_v25  ;;  %v832_v29 = vadd.f32 %v831_v26, %v3228_v58 }
 0x2dc   : > { %v835_v28 = vpop.f32.mrb[14].mxu0  ;;  %v834_v32 = vadd.f32 %v833_v27, %v3230_v60 }
 0x2dd   : > { %v836_v30 = vadd.f32 %v835_v28, %v3228_v58  ;;  %v837_v31 = vpop.f32.mrb[15].mxu0 }
 0x2de   : > { %v838_v33 = vadd.f32 %v837_v31, %v3230_v60 }
 0x2df   : > { %v883_v34 = vpack.c.bf16 %v836_v30, %v832_v29 }
 0x2e0   : > { %v3260_v35 = vpack.c.bf16 %v838_v33, %v834_v32 }
 0x2e1   : > { %2113 = vmatprep.subr.bf16.mxu1 %v883_v34 }
 0x2e2   : > { %v841_v36 = vpop.f32.mrb[16].mxu0  ;;  %2114 = vmatpush3.bf16.xpose.msra.mxu1 %v883_v34  ;;  %2145 = vmatprep.subr.bf16.mxu0 %v3260_v35 }
 0x2e3   : > { %v843_v37 = vpop.f32.mrb[17].mxu0  ;;  %2146 = vmatpush3.bf16.msra.mxu0 %v3260_v35  ;;  %v842_v39 = vadd.f32 %v841_v36, %v3228_v58 }
 0x2e4   : > { %v845_v38 = vpop.f32.mrb[18].mxu0  ;;  %v844_v42 = vadd.f32 %v843_v37, %v3230_v60  ;;  %v3344_v37 = vld [vmem:[#allocation3 + $0x18] sm:$0xff] }
 0x2e5   : > { %v846_v40 = vadd.f32 %v845_v38, %v3228_v58  ;;  %v847_v41 = vpop.f32.mrb[19].mxu0 }
 0x2e6   : > { %v848_v43 = vadd.f32 %v847_v41, %v3230_v60 }
 0x2e7   : > { %v884_v44 = vpack.c.bf16 %v846_v40, %v842_v39  ;;  %v1001_v40 = vld [vmem:[#allocation3] sm:$0xff] }
 0x2e8   : > { %v3268_v45 = vpack.c.bf16 %v848_v43, %v844_v42 }
 0x2e9   : > { %2115 = vmatprep.subr.bf16.mxu1 %v884_v44 }
 0x2ea   : > { %v851_v46 = vpop.f32.mrb[20].mxu0  ;;  %2116 = vmatpush3.bf16.xpose.msra.mxu1 %v884_v44  ;;  %2147 = vmatprep.subr.bf16.mxu0 %v3268_v45  ;;  %v3357_v44 = vld [vmem:[#allocation3 + $0x8] sm:$0xff] }
 0x2eb   : > { %v853_v47 = vpop.f32.mrb[21].mxu0  ;;  %2148 = vmatpush3.bf16.msra.mxu0 %v3268_v45  ;;  %v852_v49 = vadd.f32 %v851_v46, %v3228_v58  ;;  %v3361_v46 = vld [vmem:[#allocation3 + $0x38] sm:$0xff] }
 0x2ec   : > { %v855_v48 = vpop.f32.mrb[22].mxu0  ;;  %v854_v52 = vadd.f32 %v853_v47, %v3230_v60 }
 0x2ed   : > { %v856_v50 = vadd.f32 %v855_v48, %v3228_v58  ;;  %v857_v51 = vpop.f32.mrb[23].mxu0 }
 0x2ee   : > { %v858_v53 = vadd.f32 %v857_v51, %v3230_v60 }
 0x2ef   : > { %v885_v54 = vpack.c.bf16 %v856_v50, %v852_v49  ;;  %v3366_v49 = vld [vmem:[#allocation3 + $0x30] sm:$0xff] }
 0x2f0   : > { %v893_v55 = vpack.c.bf16 %v858_v53, %v854_v52  ;;  %v3374_v52 = vld [vmem:[#allocation3 + $0x28] sm:$0xff] }
 0x2f1   : > { %2117 = vmatprep.subr.bf16.mxu1 %v885_v54 }
 0x2f2   : > { %v861_v56 = vpop.f32.mrb[24].mxu0  ;;  %2118 = vmatpush3.bf16.xpose.msra.mxu1 %v885_v54  ;;  %2149 = vmatprep.subr.bf16.mxu0 %v893_v55 }
 0x2f3   : > { %v863_v57 = vpop.f32.mrb[25].mxu0  ;;  %2150 = vmatpush3.bf16.msra.mxu0 %v893_v55  ;;  %v862_v61 = vadd.f32 %v861_v56, %v3228_v58 }
 0x2f4   : > { %v865_v59 = vpop.f32.mrb[26].mxu0  ;;  %v864_v0 = vadd.f32 %v863_v57, %v3230_v60 }
 0x2f5   : > { %v866_v62 = vadd.f32 %v865_v59, %v3228_v58  ;;  %v867_v63 = vpop.f32.mrb[27].mxu0  ;;  %v3386_v59 = vld [vmem:[#allocation3 + $0x40] sm:$0xff] }
 0x2f6   : > { %v868_v1 = vadd.f32 %v867_v63, %v3230_v60  ;;  %v3392_v63 = vld [vmem:[#allocation3 + $0x50] sm:$0xff] }
 0x2f7   : > { %v886_v2 = vpack.c.bf16 %v866_v62, %v862_v61 }
 0x2f8   : > { %v894_v3 = vpack.c.bf16 %v868_v1, %v864_v0 }
 0x2f9   : > { %2119 = vmatprep.subr.bf16.mxu1 %v886_v2 }
 0x2fa   : > { %v871_v4 = vpop.f32.mrb[28].mxu0  ;;  %2120 = vmatpush3.bf16.xpose.msra.mxu1 %v886_v2  ;;  %2151 = vmatprep.subr.bf16.mxu0 %v894_v3  ;;  %v1012_v2 = vld [vmem:[#allocation3 + $0x58] sm:$0xff] }
 0x2fb   : > { %v873_v6 = vpop.f32.mrb[29].mxu0  ;;  %2152 = vmatpush3.bf16.msra.mxu0 %v894_v3  ;;  %v872_v8 = vadd.f32 %v871_v4, %v3228_v58 }
 0x2fc   : > { %v875_v7 = vpop.f32.mrb[30].mxu0  ;;  %v874_v11 = vadd.f32 %v873_v6, %v3230_v60 }
 0x2fd   : > { %v876_v9 = vadd.f32 %v875_v7, %v3228_v58  ;;  %v877_v10 = vpop.f32.mrb[31].mxu0  ;;  %v899_v58 = vld [vmem:[#allocation2 + $0x18] sm:$0xff]  ;;  %v3409_v7 = vld [vmem:[#allocation3 + $0x60] sm:$0xff] }
 0x2fe   : > { %v878_v12 = vadd.f32 %v877_v10, %v3230_v60  ;;  %v900_v60 = vld [vmem:[#allocation2 + $0x20] sm:$0xff] }
 0x2ff   : > { %v887_v13 = vpack.c.bf16 %v876_v9, %v872_v8  ;;  %v3411_v8 = vld [vmem:[#allocation3 + $0x48] sm:$0xff] }
 0x300   : > { %v895_v14 = vpack.c.bf16 %v878_v12, %v874_v11 }
 0x301   : > { %2121 = vmatprep.subr.bf16.mxu1 %v887_v13 }
 0x302   : > { %2122 = vmatpush3.bf16.xpose.msra.mxu1 %v887_v13  ;;  %2153 = vmatprep.subr.bf16.mxu0 %v895_v14 }
 0x303   : > { %2187 = vmatprep.subr.bf16.mxu1 %v3236_v5  ;;  %2154 = vmatpush3.bf16.msra.mxu0 %v895_v14 }
 0x309   : > { %2124 = vmatmul.mubr.bf16.vlgmr.msra.gmra.mrb[0].mxu1 %v897_v16  ;;  %v3423_v16 = vld [vmem:[#allocation3 + $0x78] sm:$0xff] }
 0x30a   : > { %2195 = vmatpush3.bf16.msra.mxu1 %v3236_v5  ;;  %2127 = vmatprep.mubr.bf16.mxu1 %v898_v17  ;;  %v902_v5 = vld [vmem:[#allocation2 + $0x30] sm:$0xff] }
 0x30b   : > { %2188 = vmatprep.subr.bf16.mxu1 %v3244_v15 }
 0x30e   : > { %2196 = vmatpush3.bf16.msra.mxu1 %v3244_v15  ;;  %v903_v15 = vld [vmem:[#allocation2 + $0x38] sm:$0xff] }
 0x30f   : > { %2189 = vmatprep.subr.bf16.mxu1 %v3252_v25 }
 0x311   : > { %2128 = vmatmul.mubr.bf16.gmra.mrb[4].mxu1 %v899_v58 }
 0x312   : > { %2197 = vmatpush3.bf16.msra.mxu1 %v3252_v25  ;;  %2131 = vmatprep.mubr.bf16.mxu1 %v900_v60 }
 0x313   : > { %2190 = vmatprep.subr.bf16.mxu1 %v3260_v35 }
 0x316   : > { %2198 = vmatpush3.bf16.msra.mxu1 %v3260_v35  ;;  %v3342_v35 = vld [vmem:[#allocation3 + $0x10] sm:$0xff] }
 0x317   : > { %2191 = vmatprep.subr.bf16.mxu1 %v3268_v45 }
 0x319   : > { %2132 = vmatmul.mubr.bf16.gmra.mrb[8].mxu1 %v901_v18 }
 0x31a   : > { %2199 = vmatpush3.bf16.msra.mxu1 %v3268_v45  ;;  %2135 = vmatprep.mubr.bf16.mxu1 %v902_v5 }
 0x31b   : > { %2192 = vmatprep.subr.bf16.mxu1 %v893_v55 }
 0x31e   : > { %2200 = vmatpush3.bf16.msra.mxu1 %v893_v55  ;;  %v3381_v55 = vld [vmem:[#allocation3 + $0x20] sm:$0xff] }
 0x31f   : > { %2193 = vmatprep.subr.bf16.mxu1 %v894_v3 }
 0x321   : > { %2136 = vmatmul.mubr.bf16.gmra.mrb[12].mxu1 %v903_v15 }
 0x322   : > { %2201 = vmatpush3.bf16.msra.mxu1 %v894_v3 }
 0x323   : > { %2194 = vmatprep.subr.bf16.mxu1 %v895_v14 }
 0x326   : > { %2202 = vmatpush3.bf16.msra.mxu1 %v895_v14  ;;  %v3419_v14 = vld [vmem:[#allocation3 + $0x70] sm:$0xff] }
 0x3dc   : > { %v3294_v19 = vpop.f32.mrb[0].mxu1 }
 0x3dd   : > { %1021 = vmax.xlane.f32.xlu0 %v3294_v19  ;;  %v3297_v20 = vpop.f32.mrb[1].mxu1 }
 0x3de   : > { %v3299_v21 = vpop.f32.mrb[2].mxu1 }
 0x3df   : > { %1023 = vmax.xlane.f32.xlu1 %v3299_v21  ;;  %v3302_v22 = vpop.f32.mrb[3].mxu1 }
 0x3e1   : > { %1017 = vmax.xlane.f32.xlu0 %v3297_v20 }
 0x3e4   : > { %v3305_v23 = vpop.f32.mrb[4].mxu1 }
 0x3e5   : > { %1019 = vmax.xlane.f32.xlu0 %v3302_v22  ;;  %v3308_v24 = vpop.f32.mrb[5].mxu1 }
 0x3e6   : > { %v3310_v25 = vpop.f32.mrb[6].mxu1 }
 0x3e7   : > { %1031 = vmax.xlane.f32.xlu1 %v3310_v25  ;;  %v3313_v26 = vpop.f32.mrb[7].mxu1 }
 0x3e9   : > { %1029 = vmax.xlane.f32.xlu0 %v3305_v23 }
 0x3eb   : > { %1027 = vmax.xlane.f32.xlu1 %v3313_v26 }
 0x3ec   : > { %v3317_v27 = vpop.f32.mrb[8].mxu1 }
 0x3ed   : > { %1025 = vmax.xlane.f32.xlu0 %v3308_v24  ;;  %v3320_v28 = vpop.f32.mrb[9].mxu1 }
 0x3ee   : > { %v3322_v29 = vpop.f32.mrb[10].mxu1 }
 0x3ef   : > { %1033 = vmax.xlane.f32.xlu1 %v3320_v28  ;;  %v3325_v30 = vpop.f32.mrb[11].mxu1 }
 0x3f1   : > { %1037 = vmax.xlane.f32.xlu0 %v3317_v27 }
 0x3f3   : > { %1039 = vmax.xlane.f32.xlu1 %v3322_v29 }
 0x3f4   : > { %v3329_v31 = vpop.f32.mrb[12].mxu1 }
 0x3f5   : > { %v3331_v32 = vpop.f32.mrb[13].mxu1 }
 0x3f6   : > { %v3333_v33 = vpop.f32.mrb[14].mxu1  ;;  %1041 = vmax.xlane.f32.xlu0 %v3331_v32 }
 0x3f7   : > { %1035 = vmax.xlane.f32.xlu1 %v3325_v30  ;;  %v3337_v34 = vpop.f32.mrb[15].mxu1 }
 0x3fa   : > { %1045 = vmax.xlane.f32.xlu0 %v3329_v31 }
 0x3fb   : > { %1047 = vmax.xlane.f32.xlu1 %v3333_v33 }
 0x3ff   : > { %1043 = vmax.xlane.f32.xlu1 %v3337_v34 }
 0x46a   : > { %v1022_v36 = vpop.xlane.xlu0 %1021 }
 0x46b   : > { %v3347_v38 = vmax.f32 %v3342_v35, %v1022_v36 }
 0x46c   : > { %v1024_v39 = vpop.xlane.xlu1 %1023 }
 0x46d   : > { %1589 = vst.msk [vmem:[#allocation3 + $0x10] sm:$0xff] %vm1321_vm1, %v3347_v38  ;;  %v3352_v41 = vmax.f32 %v3344_v37, %v1024_v39  ;;  %1125 = vperm.xlu1 %2365, %v3347_v38  }
 0x46e   : > { %v1018_v42 = vpop.xlane.xlu0 %1017 }
 0x46f   : > { %1590 = vst.msk [vmem:[#allocation3 + $0x18] sm:$0xff] %vm1321_vm1, %v3352_v41  ;;  %v1049_v43 = vmax.f32 %v1001_v40, %v1018_v42  ;;  %v1068_v58 = vsub.f32 %v3344_v37, %v3352_v41 }
 0x471   : > { %1587 = vst.msk [vmem:[#allocation3] sm:$0xff] %vm1321_vm1, %v1049_v43  ;;  %1115 = vperm.xlu0 %2366, %v1049_v43   ;;  %1130 = vperm.xlu1 %2365, %v3352_v41   ;;  %v1065_v10 = vsub.f32 %v1001_v40, %v1049_v43  ;;  %v1014_v40 = vld [vmem:[#allocation3 + $0x68] sm:$0xff]  ;;  %v1087_v41 = vmul.f32 1.442695, %v1068_v58 }
 0x472   : > { %v1020_v45 = vpop.xlane.xlu0 %1019 }
 0x473   : > { %v3364_v47 = vmax.f32 %v3357_v44, %v1020_v45  ;;  %v1081_v60 = vmul.f32 1.442695, %v1065_v10 }
 0x474   : > { %v1032_v48 = vpop.xlane.xlu1 %1031 }
 0x475   : > { %1588 = vst.msk [vmem:[#allocation3 + $0x8] sm:$0xff] %vm1321_vm1, %v3364_v47  ;;  %v3371_v50 = vmax.f32 %v3361_v46, %v1032_v48  ;;  %1120 = vperm.xlu1 %2365, %v3364_v47   ;;  %v1066_v36 = vsub.f32 %v3357_v44, %v3364_v47  ;;  %2391 = vpow2.f32 %v1081_v60  ;;  %v1067_v44 = vsub.f32 %v3342_v35, %v3347_v38 }
 0x476   : > { %v1030_v51 = vpop.xlane.xlu0 %1029  ;;  %2393 = vpow2.f32 %v1087_v41 }
 0x477   : > { %1594 = vst.msk [vmem:[#allocation3 + $0x38] sm:$0xff] %vm1321_vm1, %v3371_v50  ;;  %v3379_v53 = vmax.f32 %v3366_v49, %v1030_v51  ;;  %v1083_v47 = vmul.f32 1.442695, %v1066_v36  ;;  %v1072_v48 = vsub.f32 %v3361_v46, %v3371_v50 }
 0x478   : > { %v1028_v54 = vpop.xlane.xlu1 %1027 }
 0x479   : > { %1593 = vst.msk [vmem:[#allocation3 + $0x30] sm:$0xff] %vm1321_vm1, %v3379_v53  ;;  %v1054_v56 = vmax.f32 %v3374_v52, %v1028_v54  ;;  %v1085_v54 = vmul.f32 1.442695, %v1067_v44  ;;  %2395 = vpow2.f32 %v1083_v47  ;;  %v1071_v46 = vsub.f32 %v3366_v49, %v3379_v53 }
 0x47a   : > { %v1026_v57 = vpop.xlane.xlu0 %1025 }
 0x47b   : > { %1592 = vst.msk [vmem:[#allocation3 + $0x28] sm:$0xff] %vm1321_vm1, %v1054_v56  ;;  %v3390_v61 = vmax.f32 %v3381_v55, %v1026_v57  ;;  %1140 = vperm.xlu0 %2366, %v1054_v56   ;;  %v1070_v42 = vsub.f32 %v3374_v52, %v1054_v56  ;;  %v1095_v56 = vmul.f32 1.442695, %v1072_v48 }
 0x47c   : > { %v1034_v62 = vpop.xlane.xlu1 %1033 }
 0x47d   : > { %1591 = vst.msk [vmem:[#allocation3 + $0x20] sm:$0xff] %vm1321_vm1, %v3390_v61  ;;  %v3397_v0 = vmax.f32 %v3386_v59, %v1034_v62  ;;  %1135 = vperm.xlu1 %2365, %v3390_v61   ;;  %v1091_v51 = vmul.f32 1.442695, %v1070_v42  ;;  %v1069_v52 = vsub.f32 %v3381_v55, %v3390_v61  ;;  %v1093_v62 = vmul.f32 1.442695, %v1071_v46 }
 0x47e   : > { %v1038_v1 = vpop.xlane.xlu0 %1037 }
 0x47f   : > { %1595 = vst.msk [vmem:[#allocation3 + $0x40] sm:$0xff] %vm1321_vm1, %v3397_v0  ;;  %v3403_v3 = vmax.f32 %v3392_v63, %v1038_v1  ;;  %1150 = vperm.xlu0 %2366, %v3371_v50   ;;  %2397 = vpow2.f32 %v1091_v51  ;;  %v3455_v38 = vpop.eup %2391  ;;  %v1089_v50 = vmul.f32 1.442695, %v1069_v52 }
 0x480   : > { %v1040_v4 = vpop.xlane.xlu1 %1039  ;;  %2399 = vpow2.f32 %v1085_v54  ;;  %v3462_v61 = vpop.eup %2393 }
 0x481   : > { %1597 = vst.msk [vmem:[#allocation3 + $0x50] sm:$0xff] %vm1321_vm1, %v3403_v3  ;;  %v1060_v6 = vmax.f32 %v1012_v2, %v1040_v4  ;;  %1165 = vperm.xlu1 %2365, %v3403_v3   ;;  %2401 = vpow2.f32 %v1095_v56  ;;  %v1075_v1 = vsub.f32 %v3392_v63, %v3403_v3 }
 0x482   : > { %2403 = vpow2.f32 %v1089_v50 }
 0x483   : > { %1598 = vst.msk [vmem:[#allocation3 + $0x58] sm:$0xff] %vm1321_vm1, %v1060_v6  ;;  %v1042_v9 = vpop.xlane.xlu0 %1041  ;;  %v1076_v35 = vsub.f32 %v1012_v2, %v1060_v6  ;;  %v3467_v2 = vpop.eup %2395 }
 0x484   : > { %v1036_v11 = vpop.xlane.xlu1 %1035  ;;  %v3415_v12 = vmax.f32 %v3409_v7, %v1042_v9 }
 0x485   : > { %v1058_v13 = vmax.f32 %v3411_v8, %v1036_v11  ;;  %1155 = vperm.xlu1 %2365, %v3397_v0   ;;  %v1103_v57 = vmul.f32 1.442695, %v1076_v35 }
 0x486   : > { %1599 = vst.msk [vmem:[#allocation3 + $0x60] sm:$0xff] %vm1321_vm1, %v3415_v12  ;;  %v1077_v11 = vsub.f32 %v3409_v7, %v3415_v12 }
 0x487   : > { %1596 = vst.msk [vmem:[#allocation3 + $0x48] sm:$0xff] %vm1321_vm1, %v1058_v13  ;;  %v1046_v17 = vpop.xlane.xlu0 %1045  ;;  %v1074_v55 = vsub.f32 %v3411_v8, %v1058_v13  ;;  %2405 = vpow2.f32 %v1103_v57  ;;  %v1101_v8 = vmul.f32 1.442695, %v1075_v1 }
 0x488   : > { %v1048_v18 = vpop.xlane.xlu1 %1047  ;;  %v3429_v5 = vmax.f32 %v3419_v14, %v1046_v17  ;;  %2407 = vpow2.f32 %v1093_v62 }
 0x489   : > { %v3432_v15 = vmax.f32 %v3423_v16, %v1048_v18  ;;  %1170 = vperm.xlu1 %2365, %v1060_v6   ;;  %v1099_v49 = vmul.f32 1.442695, %v1074_v55  ;;  %v3470_v4 = vpop.eup %2397  ;;  %v1073_v6 = vsub.f32 %v3386_v59, %v3397_v0  ;;  %v1105_v0 = vmul.f32 1.442695, %v1077_v11 }
 0x48a   : > { %v1079_v39 = vsub.f32 %v3419_v14, %v3429_v5  ;;  %1601 = vst.msk [vmem:[#allocation3 + $0x70] sm:$0xff] %vm1321_vm1, %v3429_v5  ;;  %v3475_v9 = vpop.eup %2399 }
 0x48b   : > { %v1080_v37 = vsub.f32 %v3423_v16, %v3432_v15  ;;  %1602 = vst.msk [vmem:[#allocation3 + $0x78] sm:$0xff] %vm1321_vm1, %v3432_v15  ;;  %2409 = vpow2.f32 %v1099_v49  ;;  %v3478_v3 = vpop.eup %2401  ;;  %v1097_v10 = vmul.f32 1.442695, %v1073_v6 }
 0x48c   : > { %v1044_v43 = vpop.xlane.xlu1 %1043  ;;  %2411 = vpow2.f32 %v1101_v8 }
 0x48d   : > { %v1062_v45 = vmax.f32 %v1014_v40, %v1044_v43  ;;  %1160 = vperm.xlu1 %2365, %v1058_v13   ;;  %v3483_v13 = vpop.eup %2403 }
 0x48f   : > { %1600 = vst.msk [vmem:[#allocation3 + $0x68] sm:$0xff] %vm1321_vm1, %v1062_v45  ;;  %1180 = vperm.xlu0 %2366, %v1062_v45  }
 0x491   : > { %1145 = vperm.xlu1 %2365, %v3379_v53   ;;  %v1078_v53 = vsub.f32 %v1014_v40, %v1062_v45  ;;  %v3486_v59 = vpop.eup %2405 }
 0x492   : > { %v3489_v17 = vpop.eup %2407 }
 0x493   : > { %1190 = vperm.xlu0 %2366, %v3432_v15   ;;  %v1107_v63 = vmul.f32 1.442695, %v1078_v53 }
 0x495   : > { %1175 = vperm.xlu1 %2365, %v3415_v12   ;;  %2413 = vpow2.f32 %v1107_v63  ;;  %v3492_v58 = vpop.eup %2409 }
 0x496   : > { %2415 = vpow2.f32 %v1097_v10  ;;  %v3495_v7 = vpop.eup %2411 }
 0x497   : > { %1461 = vperm.xlu0 %2366, %v3455_v38   ;;  %2417 = vpow2.f32 %v1105_v0 }
 0x499   : > { %1185 = vperm.xlu1 %2365, %v3429_v5  }
 0x49b   : > { %1476 = vperm.xlu0 %2366, %v3462_v61  }
 0x49d   : > { %1466 = vperm.xlu1 %2365, %v3467_v2  }
 0x49f   : > { %1486 = vperm.xlu0 %2366, %v3470_v4   ;;  %v3498_v12 = vpop.eup %2413 }
 0x4a0   : > { %v3501_v60 = vpop.eup %2415 }
 0x4a1   : > { %1471 = vperm.xlu1 %2365, %v3475_v9   ;;  %v3504_v18 = vpop.eup %2417 }
 0x4a3   : > { %1496 = vperm.xlu0 %2366, %v3478_v3  }
 0x4a5   : > { %1481 = vperm.xlu1 %2365, %v3483_v13  }
 0x4a7   : > { %1516 = vperm.xlu0 %2366, %v3486_v59  }
 0x4a9   : > { %1491 = vperm.xlu1 %2365, %v3489_v17  }
 0x4ab   : > { %1506 = vperm.xlu0 %2366, %v3492_v58  }
 0x4ad   : > { %1511 = vperm.xlu1 %2365, %v3495_v7  }
 0x4af   : > { %1526 = vperm.xlu0 %2366, %v3498_v12  }
 0x4b1   : > { %1501 = vperm.xlu1 %2365, %v3501_v60  }
 0x4b5   : > { %1521 = vperm.xlu1 %2365, %v3504_v18  }
 0x4ec   : > { %v1126_v36 = vpop.permute.xlu1 %1125 }
 0x4ed   : > { %v1195_v40 = vsub.f32 %v3294_v19, %v1126_v36 }
 0x4ef   : > { %v1213_v41 = vmul.f32 1.442695, %v1195_v40 }
 0x4f0   : > { %v1116_v42 = vpop.permute.xlu0 %1115  ;;  %v1131_v43 = vpop.permute.xlu1 %1130 }
 0x4f1   : > { %2419 = vpow2.f32 %v1213_v41  ;;  %v1193_v45 = vsub.f32 %v3297_v20, %v1116_v42  ;;  %v1196_v44 = vsub.f32 %v3299_v21, %v1131_v43 }
 0x4f3   : > { %v1209_v47 = vmul.f32 1.442695, %v1193_v45  ;;  %v1215_v48 = vmul.f32 1.442695, %v1196_v44 }
 0x4f4   : > { %v1121_v51 = vpop.permute.xlu1 %1120 }
 0x4f5   : > { %2421 = vpow2.f32 %v1209_v47  ;;  %v1194_v54 = vsub.f32 %v3302_v22, %v1121_v51 }
 0x4f6   : > { %2423 = vpow2.f32 %v1215_v48 }
 0x4f7   : > { %v1211_v52 = vmul.f32 1.442695, %v1194_v54 }
 0x4f9   : > { %2425 = vpow2.f32 %v1211_v52 }
 0x4fa   : > { %v1141_v56 = vpop.permute.xlu0 %1140 }
 0x4fb   : > { %v2420_v35 = vpop.eup %2419  ;;  %v1198_v19 = vsub.f32 %v3313_v26, %v1141_v56 }
 0x4fc   : > { %1277 = vadd.xlane.f32.xlu0 %v2420_v35  ;;  %v1136_v46 = vpop.permute.xlu1 %1135 }
 0x4fd   : > { %v1219_v50 = vmul.f32 1.442695, %v1198_v19  ;;  %v1197_v20 = vsub.f32 %v3308_v24, %v1136_v46 }
 0x4fe   : > { %v1151_v57 = vpop.permute.xlu0 %1150 }
 0x4ff   : > { %v2422_v21 = vpop.eup %2421  ;;  %v1217_v55 = vmul.f32 1.442695, %v1197_v20  ;;  %v1200_v62 = vsub.f32 %v3310_v25, %v1151_v57  ;;  %2427 = vpow2.f32 %v1219_v50 }
 0x500   : > { %v2424_v1 = vpop.eup %2423  ;;  %1273 = vadd.xlane.f32.xlu1 %v2422_v21  ;;  %v1166_v22 = vpop.permute.xlu1 %1165 }
 0x501   : > { %2429 = vpow2.f32 %v1217_v55  ;;  %v1223_v49 = vmul.f32 1.442695, %v1200_v62  ;;  %v1339_v53 = vpack.c.bf16 %v2424_v1, %v2420_v35  ;;  %v1203_v26 = vsub.f32 %v3317_v27, %v1166_v22 }
 0x503   : > { %v2426_v6 = vpop.eup %2425  ;;  %2431 = vpow2.f32 %v1223_v49  ;;  %v1229_v63 = vmul.f32 1.442695, %v1203_v26  ;;  %v1109_v26 = vmul.f32 1.442695, %v1079_v39 }
 0x504   : > { %1279 = vadd.xlane.f32.xlu1 %v2424_v1  ;;  %1275 = vadd.xlane.f32.xlu0 %v2426_v6  ;;  %v1156_v8 = vpop.permute.xlu1 %1155  ;;  %v1338_v24 = vpack.c.bf16 %v2426_v6, %v2422_v21 }
 0x505   : > { %v1201_v25 = vsub.f32 %v3320_v28, %v1156_v8  ;;  %2433 = vpow2.f32 %v1229_v63  ;;  %v1111_v63 = vmul.f32 1.442695, %v1080_v37 }
 0x506   : > { %2155 = vmatprep.mubr.bf16.mxu0 %v1338_v24 }
 0x507   : > { %2156 = vmatmul.mubr.bf16.vlgmr.msra.gmra.mrb[32].mxu0 %v1339_v53  ;;  %v1225_v41 = vmul.f32 1.442695, %v1201_v25 }
 0x508   : > { %v1171_v10 = vpop.permute.xlu1 %1170 }
 0x509   : > { %v1204_v11 = vsub.f32 %v3322_v29, %v1171_v10  ;;  %v2428_v0 = vpop.eup %2427 }
 0x50b   : > { %v2430_v36 = vpop.eup %2429  ;;  %v1231_v40 = vmul.f32 1.442695, %v1204_v11 }
 0x50c   : > { %v1161_v42 = vpop.permute.xlu1 %1160  ;;  %v1340_v43 = vpack.c.bf16 %v2428_v0, %v2430_v36 }
 0x50d   : > { %v2432_v27 = vpop.eup %2431  ;;  %2435 = vpow2.f32 %v1231_v40  ;;  %v1202_v45 = vsub.f32 %v3325_v30, %v1161_v42 }
 0x50e   : > { %v1181_v44 = vpop.permute.xlu0 %1180  ;;  %1287 = vadd.xlane.f32.xlu1 %v2432_v27  ;;  %2159 = vmatprep.mubr.bf16.mxu0 %v1340_v43  ;;  %2437 = vpow2.f32 %v1225_v41  ;;  %v1243_v43 = vld [vmem:[#allocation4 + $0x10] sm:$0xff] }
 0x50f   : > { %v1227_v47 = vmul.f32 1.442695, %v1202_v45  ;;  %v1206_v28 = vsub.f32 %v3337_v34, %v1181_v44  ;;  %v2434_v46 = vpop.eup %2433 }
 0x510   : > { %v1146_v48 = vpop.permute.xlu1 %1145 }
 0x511   : > { %2439 = vpow2.f32 %v1227_v47  ;;  %v1199_v29 = vsub.f32 %v3305_v23, %v1146_v48  ;;  %v1235_v56 = vmul.f32 1.442695, %v1206_v28  ;;  %v1241_v47 = vld [vmem:[#allocation4] sm:$0xff] }
 0x512   : > { %v1191_v51 = vpop.permute.xlu0 %1190  ;;  %1283 = vadd.xlane.f32.xlu1 %v2428_v0  ;;  %v1257_v48 = vmul.f32 %v3455_v38, %v1241_v47 }
 0x513   : > { %v1221_v54 = vmul.f32 1.442695, %v1199_v29  ;;  %v1208_v52 = vsub.f32 %v3333_v33, %v1191_v51  ;;  %v1242_v51 = vld [vmem:[#allocation4 + $0x8] sm:$0xff] }
 0x514   : > { %v1176_v35 = vpop.permute.xlu1 %1175 }
 0x515   : > { %2441 = vpow2.f32 %v1221_v54  ;;  %v1239_v30 = vmul.f32 1.442695, %v1208_v52  ;;  %v1205_v19 = vsub.f32 %v3331_v32, %v1176_v35  ;;  %v1244_v54 = vld [vmem:[#allocation4 + $0x18] sm:$0xff] }
 0x516   : > { %v3532_v14 = vpop.permute.xlu0 %1461  ;;  %v1260_v35 = vmul.f32 %v3462_v61, %v1244_v54 }
 0x517   : > { %v2436_v50 = vpop.eup %2435  ;;  %2443 = vpow2.f32 %v1239_v30  ;;  %v1233_v20 = vmul.f32 1.442695, %v1205_v19 }
 0x518   : > { %2445 = vpow2.f32 %v1235_v56  ;;  %1295 = vadd.xlane.f32.xlu1 %v2436_v50  ;;  %v1186_v34 = vpop.permute.xlu1 %1185  ;;  %v1343_v57 = vpack.c.bf16 %v2436_v50, %v2434_v46  ;;  %v2438_v21 = vpop.eup %2437  ;;  %v1258_v56 = vmul.f32 %v3467_v2, %v1242_v51  ;;  %v1248_v50 = vld [vmem:[#allocation4 + $0x38] sm:$0xff]  ;;  %v1249_v51 = vld [vmem:[#allocation4 + $0x40] sm:$0xff] }
 0x519   : > { %2447 = vpow2.f32 %v1233_v20  ;;  %v1207_v23 = vsub.f32 %v3329_v31, %v1186_v34  ;;  %v1264_v38 = vmul.f32 %v3478_v3, %v1248_v50  ;;  %v1246_v34 = vld [vmem:[#allocation4 + $0x28] sm:$0xff] }
 0x51a   : > { %v3536_v39 = vpop.permute.xlu0 %1476  ;;  %v1262_v2 = vmul.f32 %v3470_v4, %v1246_v34  ;;  %v1444_v34 = vld [vmem:[#allocation5 + $0x8] sm:$0xff] }
 0x51b   : > { %v2440_v55 = vpop.eup %2439  ;;  %v1237_v33 = vmul.f32 1.442695, %v1207_v23 }
 0x51c   : > { %1291 = vadd.xlane.f32.xlu1 %v2440_v55  ;;  %v1342_v62 = vpack.c.bf16 %v2440_v55, %v2438_v21  ;;  %v3534_v5 = vpop.permute.xlu1 %1466 }
 0x51d   : > { %2449 = vpow2.f32 %v1237_v33 }
 0x51e   : > { %2163 = vmatprep.mubr.bf16.mxu1 %v1342_v62  ;;  %2451 = vpow2.f32 %v1109_v26  ;;  %v3540_v11 = vpop.permute.xlu0 %1486  ;;  %v1250_v62 = vld [vmem:[#allocation4 + $0x48] sm:$0xff] }
 0x51f   : > { %v2442_v1 = vpop.eup %2441  ;;  %2164 = vmatmul.mubr.bf16.vlgmr.msra.gmra.mrb[16].mxu1 %v1343_v57  ;;  %2453 = vpow2.f32 %v1111_v63  ;;  %v1266_v3 = vmul.f32 %v3492_v58, %v1250_v62  ;;  %v1254_v63 = vld [vmem:[#allocation4 + $0x68] sm:$0xff] }
 0x520   : > { %1285 = vadd.xlane.f32.xlu0 %v2442_v1  ;;  %v1341_v32 = vpack.c.bf16 %v2432_v27, %v2442_v1  ;;  %v3538_v10 = vpop.permute.xlu1 %1471  ;;  %v1259_v27 = vmul.f32 %v3475_v9, %v1243_v43 }
 0x521   : > { %v2444_v22 = vpop.eup %2443 }
 0x522   : > { %v2446_v49 = vpop.eup %2445  ;;  %1303 = vadd.xlane.f32.xlu1 %v2444_v22  ;;  %2160 = vmatmul.mubr.bf16.gmra.mrb[36].mxu0 %v1341_v32 }
 0x523   : > { %v2448_v53 = vpop.eup %2447 }
 0x524   : > { %1281 = vadd.xlane.f32.xlu0 %v2430_v36  ;;  %v1344_v6 = vpack.c.bf16 %v2446_v49, %v2448_v53  ;;  %v3542_v0 = vpop.permute.xlu1 %1481  ;;  %v3544_v36 = vpop.permute.xlu0 %1496 }
 0x526   : > { %1299 = vadd.xlane.f32.xlu1 %v2446_v49  ;;  %2167 = vmatprep.mubr.bf16.mxu1 %v1344_v6 }
 0x527   : > { %v2450_v31 = vpop.eup %2449 }
 0x528   : > { %1293 = vadd.xlane.f32.xlu0 %v2434_v46  ;;  %v1345_v8 = vpack.c.bf16 %v2444_v22, %v2450_v31  ;;  %v3526_v24 = vpop.eup %2451  ;;  %v3546_v40 = vpop.permute.xlu1 %1491  ;;  %v1247_v22 = vld [vmem:[#allocation4 + $0x30] sm:$0xff] }
 0x529   : > { %v2454_v25 = vpop.eup %2453  ;;  %v3548_v16 = vpop.permute.xlu0 %1516  ;;  %v1263_v4 = vmul.f32 %v3489_v17, %v1247_v22  ;;  %v1454_v22 = vld [vmem:[#allocation5 + $0x58] sm:$0xff] }
 0x52a   : > { %2168 = vmatmul.mubr.bf16.gmra.mrb[20].mxu1 %v1345_v8 }
 0x52c   : > { %1289 = vadd.xlane.f32.xlu0 %v2438_v21  ;;  %v3550_v15 = vpop.permute.xlu1 %1511  ;;  %v1252_v21 = vld [vmem:[#allocation4 + $0x58] sm:$0xff] }
 0x52d   : > { %v3552_v37 = vpop.permute.xlu0 %1506  ;;  %v1268_v55 = vmul.f32 %v3486_v59, %v1252_v21 }
 0x530   : > { %1301 = vadd.xlane.f32.xlu0 %v2450_v31  ;;  %v3554_v41 = vpop.permute.xlu1 %1501  ;;  %v1245_v31 = vld [vmem:[#allocation4 + $0x20] sm:$0xff] }
 0x531   : > { %v3556_v42 = vpop.permute.xlu0 %1526 }
 0x534   : > { %1297 = vadd.xlane.f32.xlu0 %v2448_v53  ;;  %v3559_v45 = vpop.permute.xlu1 %1521  ;;  %v1256_v53 = vld [vmem:[#allocation4 + $0x78] sm:$0xff] }
 0x535   : > { %v1272_v8 = vmul.f32 %v2454_v25, %v1256_v53  ;;  %v1447_v53 = vld [vmem:[#allocation5 + $0x20] sm:$0xff] }
 0x537   : > { %1531 = vperm.xlu1 %2365, %v3526_v24  }
 0x54a   : > { %1536 = vperm.xlu0 %2366, %v2454_v25  }
 0x589   : > { %v1278_v44 = vpop.xlane.xlu0 %1277 }
 0x58a   : > { %v1307_v28 = vadd.f32 %v1278_v44, %v1259_v27  ;;  %v1261_v27 = vmul.f32 %v3483_v13, %v1245_v31  ;;  %v1251_v44 = vld [vmem:[#allocation4 + $0x50] sm:$0xff]  ;;  %v1265_v13 = vmul.f32 %v3501_v60, %v1249_v51  ;;  %v1443_v60 = vld [vmem:[#allocation5] sm:$0xff]  ;;  %v1550_v31 = vmul.f32 %v3548_v16, %v1454_v22 }
 0x58b   : > { %v1267_v25 = vmul.f32 %v3495_v7, %v1251_v44  ;;  %v1543_v44 = vmul.f32 %v3542_v0, %v1447_v53  ;;  %v1457_v0 = vld [vmem:[#allocation5 + $0x70] sm:$0xff] }
 0x58c   : > { %1324 = vst.msk [vmem:[#allocation4 + $0x10] sm:$0xff] %vm1321_vm1, %v1307_v28  ;;  %v1270_v28 = vmul.f32 %v3498_v12, %v1254_v63 }
 0x58d   : > { %v1274_v29 = vpop.xlane.xlu1 %1273 }
 0x58e   : > { %v1305_v52 = vadd.f32 %v1274_v29, %v1257_v48 }
 0x590   : > { %1322 = vst.msk [vmem:[#allocation4] sm:$0xff] %vm1321_vm1, %v1305_v52 }
 0x591   : > { %v1276_v9 = vpop.xlane.xlu0 %1275  ;;  %v1280_v30 = vpop.xlane.xlu1 %1279 }
 0x592   : > { %v1306_v19 = vadd.f32 %v1276_v9, %v1258_v56  ;;  %v1308_v46 = vadd.f32 %v1280_v30, %v1260_v35  ;;  %v1255_v56 = vld [vmem:[#allocation4 + $0x70] sm:$0xff]  ;;  %v1253_v30 = vld [vmem:[#allocation4 + $0x60] sm:$0xff] }
 0x593   : > { %v1271_v12 = vmul.f32 %v3526_v24, %v1255_v56  ;;  %v1269_v7 = vmul.f32 %v3504_v18, %v1253_v30 }
 0x594   : > { %1323 = vst.msk [vmem:[#allocation4 + $0x8] sm:$0xff] %vm1321_vm1, %v1306_v19  ;;  %1325 = vst.msk [vmem:[#allocation4 + $0x18] sm:$0xff] %vm1321_vm1, %v1308_v46 }
 0x59b   : > { %v1288_v20 = vpop.xlane.xlu1 %1287 }
 0x59c   : > { %v1312_v57 = vadd.f32 %v1288_v20, %v1264_v38  ;;  %v1445_v38 = vld [vmem:[#allocation5 + $0x10] sm:$0xff]  ;;  %v1446_v20 = vld [vmem:[#allocation5 + $0x18] sm:$0xff] }
 0x59e   : > { %1329 = vst.msk [vmem:[#allocation4 + $0x38] sm:$0xff] %vm1321_vm1, %v1312_v57  ;;  %v1541_v57 = vmul.f32 %v3538_v10, %v1445_v38  ;;  %v1451_v10 = vld [vmem:[#allocation5 + $0x40] sm:$0xff] }
 0x59f   : > { %v1284_v23 = vpop.xlane.xlu1 %1283 }
 0x5a0   : > { %v1310_v61 = vadd.f32 %v1284_v23, %v1262_v2  ;;  %v1539_v2 = vmul.f32 %v3532_v14, %v1443_v60  ;;  %v1542_v23 = vmul.f32 %v3536_v39, %v1446_v20  ;;  %v1449_v14 = vld [vmem:[#allocation5 + $0x30] sm:$0xff] }
 0x5a1   : > { %v1545_v63 = vmul.f32 %v3546_v40, %v1449_v14 }
 0x5a2   : > { %1327 = vst.msk [vmem:[#allocation4 + $0x28] sm:$0xff] %vm1321_vm1, %v1310_v61 }
 0x5a5   : > { %v1296_v33 = vpop.xlane.xlu1 %1295 }
 0x5a6   : > { %v1316_v1 = vadd.f32 %v1296_v33, %v1268_v55  ;;  %v1540_v55 = vmul.f32 %v3534_v5, %v1444_v34 }
 0x5a8   : > { %1333 = vst.msk [vmem:[#allocation4 + $0x58] sm:$0xff] %vm1321_vm1, %v1316_v1 }
 0x5a9   : > { %v1292_v32 = vpop.xlane.xlu1 %1291 }
 0x5aa   : > { %v1314_v49 = vadd.f32 %v1292_v32, %v1266_v3  ;;  %v1453_v32 = vld [vmem:[#allocation5 + $0x50] sm:$0xff] }
 0x5ab   : > { %v1549_v39 = vmul.f32 %v3550_v15, %v1453_v32 }
 0x5ac   : > { %1331 = vst.msk [vmem:[#allocation4 + $0x48] sm:$0xff] %vm1321_vm1, %v1314_v49  ;;  %v1452_v49 = vld [vmem:[#allocation5 + $0x48] sm:$0xff] }
 0x5ad   : > { %v1286_v6 = vpop.xlane.xlu0 %1285 }
 0x5ae   : > { %v1311_v26 = vadd.f32 %v1286_v6, %v1263_v4  ;;  %v1547_v4 = vmul.f32 %v3554_v41, %v1451_v10  ;;  %v1450_v6 = vld [vmem:[#allocation5 + $0x38] sm:$0xff] }
 0x5af   : > { %v1304_v59 = vpop.xlane.xlu1 %1303  ;;  %v1546_v41 = vmul.f32 %v3544_v36, %v1450_v6  ;;  %v1458_v36 = vld [vmem:[#allocation5 + $0x78] sm:$0xff] }
 0x5b0   : > { %1328 = vst.msk [vmem:[#allocation4 + $0x30] sm:$0xff] %vm1321_vm1, %v1311_v26  ;;  %v1320_v43 = vadd.f32 %v1304_v59, %v1272_v8  ;;  %v1448_v59 = vld [vmem:[#allocation5 + $0x28] sm:$0xff]  ;;  %v1618_v10 = vld [vmem:[#allocation4 + $0x58] sm:$0xff] (!%p2020_p0) }
 0x5b1   : > { %v1282_v58 = vpop.xlane.xlu0 %1281 }
 0x5b2   : > { %1337 = vst.msk [vmem:[#allocation4 + $0x78] sm:$0xff] %vm1321_vm1, %v1320_v43  ;;  %v1309_v47 = vadd.f32 %v1282_v58, %v1261_v27  ;;  %v1548_v43 = vmul.f32 %v3552_v37, %v1452_v49 }
 0x5b3   : > { %v1300_v48 = vpop.xlane.xlu1 %1299 }
 0x5b4   : > { %1326 = vst.msk [vmem:[#allocation4 + $0x20] sm:$0xff] %vm1321_vm1, %v1309_v47  ;;  %v1318_v17 = vadd.f32 %v1300_v48, %v1270_v28 }
 0x5b5   : > { %v1294_v29 = vpop.xlane.xlu0 %1293 }
 0x5b6   : > { %1335 = vst.msk [vmem:[#allocation4 + $0x68] sm:$0xff] %vm1321_vm1, %v1318_v17  ;;  %v1315_v54 = vadd.f32 %v1294_v29, %v1267_v25  ;;  %v1544_v25 = vmul.f32 %v3540_v11, %v1448_v59 }
 0x5b8   : > { %1332 = vst.msk [vmem:[#allocation4 + $0x50] sm:$0xff] %vm1321_vm1, %v1315_v54  ;;  %v1532_v54 = vpop.permute.xlu1 %1531 }
 0x5b9   : > { %v1290_v52 = vpop.xlane.xlu0 %1289  ;;  %v1622_v6 = vld [vmem:[#allocation4 + $0x78] sm:$0xff] (!%p2020_p0) }
 0x5ba   : > { %v1313_v35 = vadd.f32 %v1290_v52, %v1265_v13  ;;  %v1455_v52 = vld [vmem:[#allocation5 + $0x60] sm:$0xff] }
 0x5bb   : > { %v1551_v11 = vmul.f32 %v3559_v45, %v1455_v52  ;;  %v1607_v45 = vld [vmem:[#allocation4] sm:$0xff] (!%p2020_p0) }
 0x5bc   : > { %1330 = vst.msk [vmem:[#allocation4 + $0x40] sm:$0xff] %vm1321_vm1, %v1313_v35  ;;  %v1456_v35 = vld [vmem:[#allocation5 + $0x68] sm:$0xff] }
 0x5bd   : > { %v1302_v9 = vpop.xlane.xlu0 %1301 }
 0x5be   : > { %v1319_v19 = vadd.f32 %v1302_v9, %v1271_v12  ;;  %v1553_v12 = vmul.f32 %v1532_v54, %v1457_v0 }
 0x5bf   : > { %v1617_v14 = vld [vmem:[#allocation4 + $0x50] sm:$0xff] (!%p2020_p0) }
 0x5c0   : > { %1336 = vst.msk [vmem:[#allocation4 + $0x70] sm:$0xff] %vm1321_vm1, %v1319_v19 }
 0x5c1   : > { %v1298_v46 = vpop.xlane.xlu0 %1297 }
 0x5c2   : > { %v1317_v50 = vadd.f32 %v1298_v46, %v1269_v7  ;;  %v1552_v46 = vmul.f32 %v3556_v42, %v1456_v35  ;;  %v1608_v42 = vld [vmem:[#allocation4 + $0x8] sm:$0xff] (!%p2020_p0)  ;;  %v1772_v35 = vld [vmem:[%s3123_s9 + $0x18] sm:$0xff] (!%p2020_p0) }
 0x5c4   : > { %1334 = vst.msk [vmem:[#allocation4 + $0x60] sm:$0xff] %vm1321_vm1, %v1317_v50 }
 0x5c9   : > { %v1537_v56 = vpop.permute.xlu0 %1536 }
 0x5ca   : > { %v1554_v30 = vmul.f32 %v1537_v56, %v1458_v36 }
 0x5da   : > { %v2157_v24 = vpop.f32.mrb[32].mxu0 }
 0x5db   : > { %v1557_v61 = vadd.f32 %v2157_v24, %v1541_v57  ;;  %v1380_v21 = vpop.f32.mrb[33].mxu0  ;;  %v1609_v57 = vld [vmem:[#allocation4 + $0x10] sm:$0xff] (!%p2020_p0)  ;;  %v2768_v24 = vmov (!%p2020_p0), 0  }
 0x5dc   : > { %v1555_v18 = vadd.f32 %v1539_v2, %v1380_v21  ;;  %v2158_v33 = vpop.f32.mrb[34].mxu0  ;;  %v1610_v2 = vld [vmem:[#allocation4 + $0x18] sm:$0xff] (!%p2020_p0)  ;;  %2456 = vset.pattern.permute.xlu1 (!%p2020_p0), %v2768_v24  ;;  %2455 = vset.pattern.permute.xlu0 (!%p2020_p0), %v2768_v24  ;;  %2457 = vrcp.f32 (!%p2020_p0), %v1609_v57  ;;  %v1773_v24 = vld [vmem:[%s3123_s9 + $0x20] sm:$0xff] (!%p2020_p0) }
 0x5dd   : > { %1573 = vst [vmem:[#allocation5 + $0x10] sm:$0xff] %v1557_v61  ;;  %v1558_v62 = vadd.f32 %v2158_v33, %v1542_v23  ;;  %v1383_v1 = vpop.f32.mrb[35].mxu0  ;;  %2459 = vrcp.f32 (!%p2020_p0), %v1607_v45  ;;  %v1612_v23 = vld [vmem:[#allocation4 + $0x28] sm:$0xff] (!%p2020_p0)  ;;  %v1611_v61 = vld [vmem:[#allocation4 + $0x20] sm:$0xff] (!%p2020_p0)  ;;  %v1614_v21 = vld [vmem:[#allocation4 + $0x38] sm:$0xff] (!%p2020_p0) }
 0x5de   : > { %1571 = vst [vmem:[#allocation5] sm:$0xff] %v1555_v18  ;;  %v1556_v3 = vadd.f32 %v1540_v55, %v1383_v1  ;;  %2461 = vrcp.f32 (!%p2020_p0), %v1610_v2  ;;  %v1613_v55 = vld [vmem:[#allocation4 + $0x30] sm:$0xff] (!%p2020_p0) }
 0x5df   : > { %1574 = vst [vmem:[#allocation5 + $0x18] sm:$0xff] %v1558_v62  ;;  %2463 = vrcp.f32 (!%p2020_p0), %v1608_v42  ;;  %v1616_v62 = vld [vmem:[#allocation4 + $0x48] sm:$0xff] (!%p2020_p0) }
 0x5e0   : > { %1572 = vst [vmem:[#allocation5 + $0x8] sm:$0xff] %v1556_v3  ;;  %2465 = vrcp.f32 (!%p2020_p0), %v1612_v23  ;;  %v1615_v3 = vld [vmem:[#allocation4 + $0x40] sm:$0xff] (!%p2020_p0) }
 0x5e1   : > { %2467 = vrcp.f32 (!%p2020_p0), %v1611_v61 }
 0x5e2   : > { %2469 = vrcp.f32 (!%p2020_p0), %v1614_v21 }
 0x5e3   : > { %2471 = vrcp.f32 (!%p2020_p0), %v1613_v55 }
 0x5e4   : > { %2473 = vrcp.f32 (!%p2020_p0), %v1616_v62  ;;  %v1776_v62 = vld [vmem:[%s3123_s9 + $0x38] sm:$0xff] (!%p2020_p0) }
 0x5e5   : > { %2475 = vrcp.f32 (!%p2020_p0), %v1615_v3 }
 0x5e6   : > { %v2458_v18 = vpop.eup (!%p2020_p0), %2457  ;;  %2477 = vrcp.f32 (!%p2020_p0), %v1618_v10  ;;  %v1775_v10 = vld [vmem:[%s3123_s9 + $0x30] sm:$0xff] (!%p2020_p0) }
 0x5e7   : > { %v2460_v33 = vpop.eup (!%p2020_p0), %2459  ;;  %1667 = vperm.xlu1 (!%p2020_p0), %2456, %v2458_v18   ;;  %2479 = vrcp.f32 (!%p2020_p0), %v1617_v14 }
 0x5e8   : > { %v2462_v1 = vpop.eup (!%p2020_p0), %2461  ;;  %1657 = vperm.xlu0 (!%p2020_p0), %2455, %v2460_v33  }
 0x5e9   : > { %v2464_v32 = vpop.eup (!%p2020_p0), %2463 }
 0x5ea   : > { %v2466_v22 = vpop.eup (!%p2020_p0), %2465 }
 0x5eb   : > { %1672 = vperm.xlu1 (!%p2020_p0), %2456, %v2462_v1   ;;  %v2468_v49 = vpop.eup (!%p2020_p0), %2467 }
 0x5ec   : > { %1662 = vperm.xlu0 (!%p2020_p0), %2455, %v2464_v32   ;;  %v2470_v53 = vpop.eup (!%p2020_p0), %2469 }
 0x5ef   : > { %1682 = vperm.xlu1 (!%p2020_p0), %2456, %v2466_v22  }
 0x5f0   : > { %1677 = vperm.xlu0 (!%p2020_p0), %2455, %v2468_v49  }
 0x5f2   : > { %v2165_v5 = vpop.f32.mrb[16].mxu1 }
 0x5f3   : > { %v1565_v26 = vadd.f32 %v2165_v5, %v1549_v39  ;;  %v1412_v8 = vpop.f32.mrb[17].mxu1  ;;  %v1620_v39 = vld [vmem:[#allocation4 + $0x68] sm:$0xff] (!%p2020_p0)  ;;  %v2472_v5 = vpop.eup (!%p2020_p0), %2471  ;;  %1692 = vperm.xlu1 (!%p2020_p0), %2456, %v2470_v53  }
 0x5f4   : > { %v1563_v27 = vadd.f32 %v1547_v4, %v1412_v8  ;;  %v2166_v58 = vpop.f32.mrb[18].mxu1  ;;  %v1619_v4 = vld [vmem:[#allocation4 + $0x60] sm:$0xff] (!%p2020_p0)  ;;  %2481 = vrcp.f32 (!%p2020_p0), %v1620_v39  ;;  %1687 = vperm.xlu0 (!%p2020_p0), %2455, %v2472_v5  }
 0x5f5   : > { %1581 = vst [vmem:[#allocation5 + $0x50] sm:$0xff] %v1565_v26  ;;  %v1566_v15 = vadd.f32 %v2166_v58, %v1550_v31  ;;  %v2161_v47 = vpop.f32.mrb[36].mxu0  ;;  %v1415_v28 = vpop.f32.mrb[19].mxu1  ;;  %2483 = vrcp.f32 (!%p2020_p0), %v1619_v4  ;;  %v1621_v26 = vld [vmem:[#allocation4 + $0x70] sm:$0xff] (!%p2020_p0) }
 0x5f6   : > { %1579 = vst [vmem:[#allocation5 + $0x40] sm:$0xff] %v1563_v27  ;;  %v1561_v48 = vadd.f32 %v2161_v47, %v1545_v63  ;;  %v1564_v16 = vadd.f32 %v1548_v43, %v1415_v28  ;;  %v1396_v17 = vpop.f32.mrb[37].mxu0  ;;  %v2474_v31 = vpop.eup (!%p2020_p0), %2473  ;;  %2485 = vrcp.f32 (!%p2020_p0), %v1622_v6  ;;  %v1639_v47 = vld [vmem:[#allocation5] sm:$0xff] (!%p2020_p0)  ;;  %v3606_v28 = vstv (!%p2020_p0), %s1751_s22  ;;  %v1778_v6 = vld [vmem:[%s3123_s9 + $0x48] sm:$0xff] (!%p2020_p0) }
 0x5f7   : > { %1582 = vst [vmem:[#allocation5 + $0x58] sm:$0xff] %v1566_v15  ;;  %v1559_v40 = vadd.f32 %v1543_v44, %v1396_v17  ;;  %v2162_v29 = vpop.f32.mrb[38].mxu0  ;;  %v2476_v8 = vpop.eup (!%p2020_p0), %2475  ;;  %1702 = vperm.xlu1 (!%p2020_p0), %2456, %v2474_v31   ;;  %2487 = vrcp.f32 (!%p2020_p0), %v1621_v26  ;;  %v1641_v15 = vld [vmem:[#allocation5 + $0x10] sm:$0xff] (!%p2020_p0) }
 0x5f8   : > { %1577 = vst [vmem:[#allocation5 + $0x30] sm:$0xff] %v1561_v48  ;;  %1580 = vst [vmem:[#allocation5 + $0x48] sm:$0xff] %v1564_v16  ;;  %v1562_v37 = vadd.f32 %v2162_v29, %v1546_v41  ;;  %v1399_v51 = vpop.f32.mrb[39].mxu0  ;;  %v2478_v59 = vpop.eup (!%p2020_p0), %2477  ;;  %1697 = vperm.xlu0 (!%p2020_p0), %2455, %v2476_v8   ;;  %v1771_v17 = vld [vmem:[%s3123_s9 + $0x10] sm:$0xff] (!%p2020_p0) }
 0x5f9   : > { %1575 = vst [vmem:[#allocation5 + $0x20] sm:$0xff] %v1559_v40  ;;  %v1560_v13 = vadd.f32 %v1544_v25, %v1399_v51  ;;  %v2480_v63 = vpop.eup (!%p2020_p0), %2479  ;;  %v1642_v40 = vld [vmem:[#allocation5 + $0x18] sm:$0xff] (!%p2020_p0)  ;;  %v1640_v51 = vld [vmem:[#allocation5 + $0x8] sm:$0xff] (!%p2020_p0) }
 0x5fa   : > { %1578 = vst [vmem:[#allocation5 + $0x38] sm:$0xff] %v1562_v37  ;;  %v1769_v37 = vld [vmem:[%s3123_s9] sm:$0xff] (!%p2020_p0) }
 0x5fb   : > { %1576 = vst [vmem:[#allocation5 + $0x28] sm:$0xff] %v1560_v13  ;;  %1712 = vperm.xlu1 (!%p2020_p0), %2456, %v2478_v59   ;;  %v1777_v59 = vld [vmem:[%s3123_s9 + $0x40] sm:$0xff] (!%p2020_p0) }
 0x5fc   : > { %1707 = vperm.xlu0 (!%p2020_p0), %2455, %v2480_v63   ;;  %v1649_v63 = vld [vmem:[#allocation5 + $0x50] sm:$0xff] (!%p2020_p0) }
 0x5fd   : > { %v2169_v9 = vpop.f32.mrb[20].mxu1  ;;  %1606 = sbr.rel (%p2020_p0) target bundleno = 1675 (0x68b), region = 68  ;;  %v1647_v22 = vld [vmem:[#allocation5 + $0x40] sm:$0xff] (!%p2020_p0) }
 0x5fe   : > { %v1569_v19 = vadd.f32 %v2169_v9, %v1553_v12  ;;  %v1428_v7 = vpop.f32.mrb[21].mxu1  ;;  %v2482_v43 = vpop.eup (!%p2020_p0), %2481  ;;  %v1650_v26 = vld [vmem:[#allocation5 + $0x58] sm:$0xff] (!%p2020_p0) }
 0x5ff   : > { %v1567_v50 = vadd.f32 %v1551_v11, %v1428_v7  ;;  %v2170_v38 = vpop.f32.mrb[22].mxu1  ;;  %v2484_v27 = vpop.eup (!%p2020_p0), %2483  ;;  %1722 = vperm.xlu1 (!%p2020_p0), %2456, %v2482_v43   ;;  %v1645_v42 = vld [vmem:[#allocation5 + $0x30] sm:$0xff] (!%p2020_p0)  ;;  %v1648_v3 = vld [vmem:[#allocation5 + $0x48] sm:$0xff] (!%p2020_p0) }
 0x600   : > { %1585 = vst [vmem:[#allocation5 + $0x70] sm:$0xff] %v1569_v19  ;;  %v1570_v60 = vadd.f32 %v2170_v38, %v1554_v30  ;;  %v1431_v20 = vpop.f32.mrb[23].mxu1  ;;  %v2486_v58 = vpop.eup (!%p2020_p0), %2485  ;;  %1717 = vperm.xlu0 (!%p2020_p0), %2455, %v2484_v27   ;;  %v1770_v30 = vld [vmem:[%s3123_s9 + $0x8] sm:$0xff] (!%p2020_p0)  ;;  %v1643_v19 = vld [vmem:[#allocation5 + $0x20] sm:$0xff] (!%p2020_p0) }
 0x601   : > { %1583 = vst [vmem:[#allocation5 + $0x60] sm:$0xff] %v1567_v50  ;;  %v1568_v34 = vadd.f32 %v1552_v46, %v1431_v20  ;;  %v2488_v44 = vpop.eup (!%p2020_p0), %2487  ;;  %v1646_v45 = vld [vmem:[#allocation5 + $0x38] sm:$0xff] (!%p2020_p0) }
 0x602   : > { %1586 = vst [vmem:[#allocation5 + $0x78] sm:$0xff] %v1570_v60  ;;  %v1644_v11 = vld [vmem:[#allocation5 + $0x28] sm:$0xff] (!%p2020_p0) }
 0x603   : > { %1584 = vst [vmem:[#allocation5 + $0x68] sm:$0xff] %v1568_v34  ;;  %1732 = vperm.xlu1 (!%p2020_p0), %2456, %v2486_v58   ;;  %v1774_v34 = vld [vmem:[%s3123_s9 + $0x28] sm:$0xff] (!%p2020_p0) }
 0x604   : > { %1727 = vperm.xlu0 %2455, %v2488_v44  }
 0x666   : > { %v1668_v41 = vpop.permute.xlu1 %1667 }
 0x667   : > { %v1737_v48 = vmul.f32 %v1668_v41, %v1641_v15  ;;  %v1658_v16 = vpop.permute.xlu0 %1657  ;;  %v1780_v41 = vld [vmem:[%s3123_s9 + $0x58] sm:$0xff] }
 0x668   : > { %v1735_v25 = vmul.f32 %v1658_v16, %v1639_v47  ;;  %v1652_v16 = vld [vmem:[#allocation5 + $0x68] sm:$0xff] }
 0x669   : > { %v1755_v29 = vmul.f32 %v3606_v28, %v1737_v48 }
 0x66a   : > { %v1753_v0 = vmul.f32 %v3606_v28, %v1735_v25  ;;  %v1673_v54 = vpop.permute.xlu1 %1672  ;;  %v1779_v25 = vld [vmem:[%s3123_s9 + $0x50] sm:$0xff] }
 0x66b   : > { %v1787_v13 = vadd.f32 %v1771_v17, %v1755_v29  ;;  %v1738_v52 = vmul.f32 %v1673_v54, %v1642_v40  ;;  %v1663_v36 = vpop.permute.xlu0 %1662  ;;  %v1651_v40 = vld [vmem:[#allocation5 + $0x60] sm:$0xff] }
 0x66c   : > { %v1785_v56 = vadd.f32 %v1769_v37, %v1753_v0  ;;  %v1736_v12 = vmul.f32 %v1663_v36, %v1640_v51 }
 0x66d   : > { %1803 = vst [vmem:[%s3145_s17 + $0x10] sm:$0xff] %v1787_v13  ;;  %v1756_v9 = vmul.f32 %v3606_v28, %v1738_v52  ;;  %v1782_v52 = vld [vmem:[%s3123_s9 + $0x68] sm:$0xff] }
 0x66e   : > { %1801 = vst [vmem:[%s3145_s17] sm:$0xff] %v1785_v56  ;;  %v1754_v7 = vmul.f32 %v3606_v28, %v1736_v12  ;;  %v1683_v46 = vpop.permute.xlu1 %1682  ;;  %v1654_v56 = vld [vmem:[#allocation5 + $0x78] sm:$0xff]  ;;  %v1781_v12 = vld [vmem:[%s3123_s9 + $0x60] sm:$0xff] }
 0x66f   : > { %v1788_v50 = vadd.f32 %v1772_v35, %v1756_v9  ;;  %v1740_v38 = vmul.f32 %v1683_v46, %v1644_v11  ;;  %v1678_v60 = vpop.permute.xlu0 %1677  ;;  %v1653_v11 = vld [vmem:[#allocation5 + $0x70] sm:$0xff] }
 0x670   : > { %v1786_v20 = vadd.f32 %v1770_v30, %v1754_v7  ;;  %v1739_v57 = vmul.f32 %v1678_v60, %v1643_v19 }
 0x671   : > { %1804 = vst [vmem:[%s3145_s17 + $0x18] sm:$0xff] %v1788_v50  ;;  %v1758_v2 = vmul.f32 %v3606_v28, %v1740_v38  ;;  %v1784_v38 = vld [vmem:[%s3123_s9 + $0x78] sm:$0xff] }
 0x672   : > { %1802 = vst [vmem:[%s3145_s17 + $0x8] sm:$0xff] %v1786_v20  ;;  %v1757_v23 = vmul.f32 %v3606_v28, %v1739_v57  ;;  %v1693_v61 = vpop.permute.xlu1 %1692 }
 0x673   : > { %v1790_v21 = vadd.f32 %v1774_v34, %v1758_v2  ;;  %v1742_v55 = vmul.f32 %v1693_v61, %v1646_v45  ;;  %v1688_v18 = vpop.permute.xlu0 %1687  ;;  %v1783_v34 = vld [vmem:[%s3123_s9 + $0x70] sm:$0xff] }
 0x674   : > { %v1789_v33 = vadd.f32 %v1773_v24, %v1757_v23  ;;  %v1741_v1 = vmul.f32 %v1688_v18, %v1645_v42 }
 0x675   : > { %1806 = vst [vmem:[%s3145_s17 + $0x28] sm:$0xff] %v1790_v21  ;;  %v1760_v32 = vmul.f32 %v3606_v28, %v1742_v55 }
 0x676   : > { %1805 = vst [vmem:[%s3145_s17 + $0x20] sm:$0xff] %v1789_v33  ;;  %v1759_v14 = vmul.f32 %v3606_v28, %v1741_v1  ;;  %v1703_v49 = vpop.permute.xlu1 %1702 }
 0x677   : > { %v1792_v39 = vadd.f32 %v1776_v62, %v1760_v32  ;;  %v1744_v53 = vmul.f32 %v1703_v49, %v1648_v3  ;;  %v1698_v4 = vpop.permute.xlu0 %1697 }
 0x678   : > { %v1791_v5 = vadd.f32 %v1775_v10, %v1759_v14  ;;  %v1743_v31 = vmul.f32 %v1698_v4, %v1647_v22 }
 0x679   : > { %1808 = vst [vmem:[%s3145_s17 + $0x38] sm:$0xff] %v1792_v39  ;;  %v1762_v8 = vmul.f32 %v3606_v28, %v1744_v53 }
 0x67a   : > { %1807 = vst [vmem:[%s3145_s17 + $0x30] sm:$0xff] %v1791_v5  ;;  %v1761_v43 = vmul.f32 %v3606_v28, %v1743_v31  ;;  %v1713_v27 = vpop.permute.xlu1 %1712 }
 0x67b   : > { %v1794_v58 = vadd.f32 %v1778_v6, %v1762_v8  ;;  %v1746_v44 = vmul.f32 %v1713_v27, %v1650_v26  ;;  %v1708_v15 = vpop.permute.xlu0 %1707 }
 0x67c   : > { %v1793_v47 = vadd.f32 %v1777_v59, %v1761_v43  ;;  %v1745_v48 = vmul.f32 %v1708_v15, %v1649_v63 }
 0x67d   : > { %1810 = vst [vmem:[%s3145_s17 + $0x48] sm:$0xff] %v1794_v58  ;;  %v1764_v17 = vmul.f32 %v3606_v28, %v1746_v44 }
 0x67e   : > { %1809 = vst [vmem:[%s3145_s17 + $0x40] sm:$0xff] %v1793_v47  ;;  %v1763_v29 = vmul.f32 %v3606_v28, %v1745_v48  ;;  %v1723_v37 = vpop.permute.xlu1 %1722 }
 0x67f   : > { %v1796_v51 = vadd.f32 %v1780_v41, %v1764_v17  ;;  %v1748_v0 = vmul.f32 %v1723_v37, %v1652_v16  ;;  %v1718_v54 = vpop.permute.xlu0 %1717 }
 0x680   : > { %v1795_v13 = vadd.f32 %v1779_v25, %v1763_v29  ;;  %v1747_v36 = vmul.f32 %v1718_v54, %v1651_v40 }
 0x681   : > { %1812 = vst [vmem:[%s3145_s17 + $0x58] sm:$0xff] %v1796_v51  ;;  %v1766_v35 = vmul.f32 %v3606_v28, %v1748_v0 }
 0x682   : > { %1811 = vst [vmem:[%s3145_s17 + $0x50] sm:$0xff] %v1795_v13  ;;  %v1765_v9 = vmul.f32 %v3606_v28, %v1747_v36  ;;  %v1733_v30 = vpop.permute.xlu1 %1732 }
 0x683   : > { %v1798_v19 = vadd.f32 %v1782_v52, %v1766_v35  ;;  %v1750_v7 = vmul.f32 %v1733_v30, %v1654_v56  ;;  %v1728_v46 = vpop.permute.xlu0 %1727 }
 0x684   : > { %v1797_v50 = vadd.f32 %v1781_v12, %v1765_v9  ;;  %v1749_v60 = vmul.f32 %v1728_v46, %v1653_v11 }
 0x685   : > { %1814 = vst [vmem:[%s3145_s17 + $0x68] sm:$0xff] %v1798_v19  ;;  %v1768_v20 = vmul.f32 %v3606_v28, %v1750_v7 }
 0x686   : > { %1813 = vst [vmem:[%s3145_s17 + $0x60] sm:$0xff] %v1797_v50  ;;  %v1767_v57 = vmul.f32 %v3606_v28, %v1749_v60 }
 0x687   : > { %v1800_v45 = vadd.f32 %v1784_v38, %v1768_v20 }
 0x688   : > { %v1799_v2 = vadd.f32 %v1783_v34, %v1767_v57 }
 0x689   : > { %1816 = vst [vmem:[%s3145_s17 + $0x78] sm:$0xff] %v1800_v45 }
 0x68a   : > { %1815 = vst [vmem:[%s3145_s17 + $0x70] sm:$0xff] %v1799_v2 }
 0x68b PF: > { %s3814_s12 = sld [smem:[#allocation24_spill]]  ;;  %s3815_s29 = sld [smem:[#allocation25_spill]] }
 0x68c   : > { %s1833_s6 = sshll.u32 %s3145_s17, 4  ;;  %s3817_s25 = sld [smem:[#allocation37_spill]]  ;;  %s3659_s6 = int_to_ptr.vmem [resolvable:$true] %s1833_s6 }
 0x68d   : > { %s1818_s19 = scalar_lea.sflag [#allocation10], %s3119_s5  ;;  %s2605_s21 = scalar_lea.vmem %s3659_s6, 2048 }
 0x68e   : > { %p2606_p8 = scmp.ne.s32.totalorder %s3659_s6, %s2605_s21  ;;  %s2769_s0 = smov [#allocation16]  }
 0x68f   : > { %s2609_s17 = sshll.u32 %s2769_s0, 4  ;;  %s2610_s17 = int_to_ptr.vmem [resolvable:$false] %s2609_s17 }
 0x690   : > { %p2607_p1 = pnand %p2606_p8, %p2979_p5  ;;  %s2611_s24 = scalar_lea.vmem %s2610_s17, 4096 }
 0x691   : > { %s2022_s4 = sshll.u32 %s3814_s12, 4  ;;  %s2023_s16 = sshll.u32 %s3815_s29, 5 }
 0x692   : > { %s1830_s15 = sadd.s32 %s2023_s16, %s2022_s4  ;;  %p2608_p11 = pneg %p2607_p1 }
 0x693   : > { %s2024_s9 = sshll.u32 %s1830_s15, 7  ;;  %p2612_p7 = scmp.lt.s32.totalorder %s3659_s6, %s2610_s17 }
 0x694   : > { %s3664_s23 = scalar_lea.hbm %s3817_s25, %s2024_s9  ;;  %p2613_p2 = scmp.lt.s32.totalorder %s2611_s24, %s2605_s21 }
 0x696   : > { %p2614_p13 = por %p2613_p2, %p2612_p7 }
 0x698   : > { %p2615_p12 = pnand %p2614_p13, %p2608_p11 }
 0x69a   : > { %2618 = shalt.err (!%p2615_p12)
}
 0x69b   : > { %s2619_s22 = scalar_lea.hbm %s3664_s23, 2048  ;;  %s2623_s4 = scalar_lea.hbm %s3817_s25, 8192 }
 0x69c   : > { %p2620_p3 = scmp.ne.s32.totalorder %s3664_s23, %s2619_s22  ;;  %p2624_p10 = scmp.lt.u32.totalorder %s3664_s23, %s3817_s25 }
 0x69d   : > { %p2625_p4 = scmp.lt.u32.totalorder %s2623_s4, %s2619_s22  ;;  %p2627_p8 = scmp.lt.u32.totalorder %s2619_s22, %s3664_s23 }
 0x69e   : > { %p2621_p9 = pnand %p2620_p3, %p2979_p5 }
 0x69f   : > { %p2626_p0 = por %p2625_p4, %p2624_p10 }
 0x6a0   : > { %p2622_p6 = pneg %p2621_p9 }
 0x6a1   : > { %p2628_p1 = por %p2627_p8, %p2626_p0 }
 0x6a3   : > { %p2629_p11 = pnand %p2628_p1, %p2622_p6 }
 0x6a5   : > { %2632 = shalt.err (!%p2629_p11)
}
 0x6a6   : > { %s2770_s9 = smov 128   ;;  %s2771_s18 = smov 8  }
 0x6a7   : > { %2215 = dma.vmem_to_hbm [thread:$0]  (%p2979_p5), %s3659_s6, 2048, %s3664_s23, %s1818_s19, %s2770_s9, %s2770_s9, %s2771_s18  }
 0x6a8 PF: > { %s3818_s26 = sld [smem:[#allocation22_spill]]  ;;  %s3819_s21 = sld [smem:[#allocation29_spill]] }
 0x6a9   : > { %p2240_p7 = scmp.ge.s32.totalorder %s2755_s14, 2 }
 0x6ae   : > { %s1848_s0 = sand.u32 1, %s3818_s26   ;;  %p3820_p2 = scmp.ne.s32.totalorder %s3819_s21, 0 }
 0x6af   : > { %s1849_s17 = scalar_lea.sflag [#allocation10], %s1848_s0 }
 0x6b0   : > { %p2232_p13 = pnand %p2240_p7, %p3820_p2 }
 0x6b2   : > { %2702 = dma.done.wait (!%p2232_p13), %s1849_s17, 2048  }
 0x6b3   : > { %2704 = vsyncadd (!%p2232_p13), %s1849_s17, 4294965248  ;;  %s28_s14 = sadd.s32 1, %s2755_s14   ;;  %s3822_s9 = sld [smem:[#allocation26_spill]] }
 0x6b4   : > { %p3695_p12 = scmp.ge.s32.totalorder %s28_s14, 10   ;;  %s3823_s5 = sld [smem:[#allocation30_spill]] }
 0x6b5   : > { %s3824_s12 = sld [smem:[#allocation32_spill]]  ;;  %s3825_s20 = smov %s3845_s10 }
 0x6b6   : > { %s3826_s26 = smov %s2711_s27  ;;  %s3827_s27 = smov %s2715_s28 }
 0x6b7   : > { %s3828_s28 = smov %s3066_s3  ;;  %s3829_s29 = smov %s2723_s30 }
 0x6b8   : > { %s3830_s30 = smov %s2727_s8  ;;  %s3831_s8 = smov %s3007_s7 }
 0x6b9   : > { %s3832_s0 = smov %s2743_s11  ;;  %s3833_s10 = smov %s2751_s13 }
 0x6ba   : > { %s3834_s11 = smov %s3823_s5  ;;  %s3835_s13 = smov %s3825_s20 }
 0x6bb   :  { %27 = sbr.rel (!%p3695_p12) target bundleno = 20 (0x14), region = 118 }
 0x6c2   :  { %1854 = vsyncpa [#allocation9], 1 }
 0x6c3   :  { %1856 = vsyncpa [#allocation9 + $0x1], 1 }
 0x6c4   :  { %1857 = vsyncpa [#allocation12], 1 }
 0x6c5   :  { %1859 = vsyncpa [#allocation12 + $0x1], 1 }
 0x6c6   :  { %1860 = vsyncpa [#allocation15], 1 }
 0x6c7   :  { %1861 = vsyncpa [#allocation10], 1 }
 0x6c8   :  { %1863 = vsyncpa [#allocation10 + $0x1], 1 }

</bundles_post_ra>
